<compile_context>
chip_gen: v7x
topology: tpu7x:2x2x1
jax: 0.10.0
libtpu: 0.0.40
codegen_flags: <defaults>
</compile_context>

<pallas_src>
import jax
import jax.numpy as jnp
from jax import lax
from jax.experimental import pallas as pl
from jax.experimental.pallas import tpu as pltpu

_BN_EPS = 1e-5
_REFS_PER_STAGE = 10  # skip, w_up, b_up, unpack, w1, g1, b1, w2, g2, b2


# ------------------------------ BlockSpec helper -------------------------------

def _full_spec(shape):
    """Whole-array block (single grid step); block == full array dims, so the
    (8,128) divisibility rule is satisfied trivially."""
    nd = len(shape)
    return pl.BlockSpec(tuple(shape), lambda i, _nd=nd: (0,) * _nd)


# ------------------------------ kernel helpers ---------------------------------

def _conv3_lhs(h):
    """(T, C) -> (T, 3C): rows are [h[t-1], h[t], h[t+1]] (zero padded, 'same')."""
    zero = jnp.zeros((1, h.shape[1]), jnp.float32)
    h_prev = jnp.concatenate([zero, h[:-1, :]], axis=0)
    h_next = jnp.concatenate([h[1:, :], zero], axis=0)
    return jnp.concatenate([h_prev, h, h_next], axis=1)


def _bn_affine(s1, s2, count, gamma, beta):
    """Exact training-mode BatchNorm1d affine from in-kernel (sum, sumsq)."""
    mean = s1 / count
    var = jnp.maximum(s2 / count - mean * mean, 0.0)   # biased variance
    scale = gamma * lax.rsqrt(var + _BN_EPS)           # EUP slot
    shift = beta - mean * scale
    return scale, shift


# --------------------------------- the kernel ----------------------------------

def _decoder_kernel(*refs):
    n_stages = (len(refs) - 4) // _REFS_PER_STAGE
    x_ref = refs[0]
    wf_ref, bf_ref, o_ref = refs[-3], refs[-2], refs[-1]
    batch = x_ref.shape[0]

    # NCL input -> per-sequence (L, C) activations (tiny in-kernel XLU transposes).
    hs = [x_ref[n].T.astype(jnp.float32) for n in range(batch)]

    for si in range(n_stages):
        (skip_ref, w_up_ref, b_up_ref, unpack_ref,
         w1_ref, g1_ref, b1_ref, w2_ref, g2_ref, b2_ref) = refs[
            1 + si * _REFS_PER_STAGE: 1 + (si + 1) * _REFS_PER_STAGE]

        w_up = w_up_ref[...]          # (Cin, K*Co) bf16, columns ordered (k, co)
        b_up = b_up_ref[...]          # (1, Co) f32
        unpack = unpack_ref[...]      # (Ls, K*L) f32 0/1 selection (+ crop)
        w1 = w1_ref[...]              # (3*(Co+Cs), C1) bf16, tap-major rows
        w2 = w2_ref[...]              # (3*C1, C2) bf16
        co = b_up.shape[1]
        kk = w_up.shape[1] // co

        # ---- ConvTranspose1d (stride==kernel) + crop + cat([x, skip]) + Conv #1 ----
        ys1, sum1, sq1 = [], 0.0, 0.0
        for n in range(batch):
            packed = jnp.dot(hs[n].astype(jnp.bfloat16), w_up,
                             preferred_element_type=jnp.float32)           # (L, K*Co)
            phases = jnp.concatenate(
                [packed[:, k * co:(k + 1) * co] for k in range(kk)], axis=0)  # (K*L, Co)
            u = jnp.dot(unpack, phases, preferred_element_type=jnp.float32) + b_up
            skp = skip_ref[n].T.astype(jnp.float32)                         # (Ls, Cs)
            h = jnp.concatenate([u, skp], axis=1)                           # [x, route]
            y1 = jnp.dot(_conv3_lhs(h).astype(jnp.bfloat16), w1,
                         preferred_element_type=jnp.float32)                # (Ls, C1)
            ys1.append(y1)
            sum1 = sum1 + jnp.sum(y1, axis=0, keepdims=True)
            sq1 = sq1 + jnp.sum(y1 * y1, axis=0, keepdims=True)
        scale1, shift1 = _bn_affine(sum1, sq1, batch * ys1[0].shape[0],
                                    g1_ref[...], b1_ref[...])

        # ---- BN #1 + ReLU + Conv #2 ----
        ys2, sum2, sq2 = [], 0.0, 0.0
        for n in range(batch):
            h1 = jnp.maximum(ys1[n] * scale1 + shift1, 0.0)
            y2 = jnp.dot(_conv3_lhs(h1).astype(jnp.bfloat16), w2,
                         preferred_element_type=jnp.float32)                # (Ls, C2)
            ys2.append(y2)
            sum2 = sum2 + jnp.sum(y2, axis=0, keepdims=True)
            sq2 = sq2 + jnp.sum(y2 * y2, axis=0, keepdims=True)
        scale2, shift2 = _bn_affine(sum2, sq2, batch * ys2[0].shape[0],
                                    g2_ref[...], b2_ref[...])
        hs = [jnp.maximum(ys2[n] * scale2 + shift2, 0.0) for n in range(batch)]

    # ---- exit Conv1d(kernel=1, bias): emit (Cexit, L) so the store IS the NCL out ----
    wf = wf_ref[...]                  # (Cexit, Clast) bf16
    bf = bf_ref[...]                  # (Cexit, 1) f32
    for n in range(batch):
        o = lax.dot_general(wf, hs[n].astype(jnp.bfloat16),
                            (((1,), (1,)), ((), ())),
                            preferred_element_type=jnp.float32) + bf
        o_ref[n] = o


# ------------------------------ host-side helpers -------------------------------

def _unpack_matrix(ls, k, l_in):
    """(Ls, K*L) 0/1 matrix: row t selects phase-major entry (t%K)*L + t//K, i.e. it
    un-interleaves the per-tap ConvTranspose outputs AND crops to the skip length.
    Built only from static shapes -> constant-folded under jit."""
    t = jnp.arange(ls)
    src = (t % k) * l_in + (t // k)
    return (jnp.arange(k * l_in)[None, :] == src[:, None]).astype(jnp.float32)


def prepare_decoder_params(params):
    """One-time packing of PyTorch-layout params into kernel operands."""
    prep = {"stages": []}
    for st in params["stages"]:
        tr_w = st["tr_w"]                                   # (Cin, Co, K)
        cin, co, kk = tr_w.shape
        w_up = jnp.transpose(tr_w, (0, 2, 1)).reshape(cin, kk * co).astype(jnp.bfloat16)
        b_up = st["tr_b"][None, :].astype(jnp.float32)      # (1, Co)
        blk1, blk2 = st["cnn"]
        w1 = jnp.transpose(blk1["w"], (2, 1, 0)).reshape(
            3 * blk1["w"].shape[1], blk1["w"].shape[0]).astype(jnp.bfloat16)
        w2 = jnp.transpose(blk2["w"], (2, 1, 0)).reshape(
            3 * blk2["w"].shape[1], blk2["w"].shape[0]).astype(jnp.bfloat16)
        prep["stages"].append({
            "w_up": w_up, "b_up": b_up,
            "w1": w1, "g1": blk1["gamma"][None, :].astype(jnp.float32),
            "b1": blk1["beta"][None, :].astype(jnp.float32),
            "w2": w2, "g2": blk2["gamma"][None, :].astype(jnp.float32),
            "b2": blk2["beta"][None, :].astype(jnp.float32),
        })
    prep["wf"] = params["final_w"][:, :, 0].astype(jnp.bfloat16)   # (Cexit, Clast)
    prep["bf"] = params["final_b"][:, None].astype(jnp.float32)    # (Cexit, 1)
    return prep


def decoder_forward(prep, x, routes_connection):
    routes = list(routes_connection)
    routes.pop(-1)                                   # deepest skip unused (as in PyTorch)
    n, _, length = x.shape

    args, in_specs = [x], [_full_spec(x.shape)]
    flops = 0
    for st in prep["stages"]:
        w_up, b_up = st["w_up"], st["b_up"]
        co = b_up.shape[1]
        kk = w_up.shape[1] // co
        skip = routes.pop(-1)
        ls = skip.shape[2]
        if ls > kk * length:
            raise ValueError(f"skip length {ls} exceeds upsampled length {kk * length}")
        unpack = _unpack_matrix(ls, kk, length)
        stage_args = [skip, w_up, b_up, unpack, st["w1"], st["g1"], st["b1"],
                      st["w2"], st["g2"], st["b2"]]
        args += stage_args
        in_specs += [_full_spec(a.shape) for a in stage_args]
        flops += 2 * n * (length * w_up.shape[0] * w_up.shape[1]
                          + ls * kk * length * co
                          + ls * st["w1"].shape[0] * st["w1"].shape[1]
                          + ls * st["w2"].shape[0] * st["w2"].shape[1])
        length = ls

    args += [prep["wf"], prep["bf"]]
    in_specs += [_full_spec(prep["wf"].shape), _full_spec(prep["bf"].shape)]
    c_exit, c_last = prep["wf"].shape
    flops += 2 * n * length * c_last * c_exit

    out_shape = jax.ShapeDtypeStruct((n, c_exit, length), jnp.float32)
    bytes_accessed = (sum(int(a.size) * a.dtype.itemsize for a in args)
                      + n * c_exit * length * 4)

    return pl.pallas_call(
        _decoder_kernel,
        grid=(1,),
        in_specs=in_specs,
        out_specs=_full_spec((n, c_exit, length)),
        out_shape=out_shape,
        compiler_params=pltpu.CompilerParams(
            dimension_semantics=("arbitrary",),
            vmem_limit_bytes=32 * 1024 * 1024),
        cost_estimate=pl.CostEstimate(flops=int(flops), transcendentals=0,
                                      bytes_accessed=int(bytes_accessed)),
    )(*args)


# ------------------------------ parameter init ----------------------------------

def init_decoder_params(key, in_channels, out_channels, exit_channels,
                        maxpool_kernel_sizes, uphill):
    """Deterministic parameter init following the PyTorch module's shapes."""
    params = {"stages": []}
    ic, oc = in_channels, out_channels
    for i in range(uphill):
        K = maxpool_kernel_sizes[uphill - i - 1]
        key, k1, k2, k3, k4 = jax.random.split(key, 5)
        tr_w = 0.1 * jax.random.normal(k1, (ic, oc, K), jnp.float32)     # (Cin,Cout,K)
        tr_b = 0.1 * jax.random.normal(k2, (oc,), jnp.float32)
        cnn = []
        c_in = ic                                    # CNNBlocks(in=ic, out=oc)
        for kk in (k3, k4):
            ka, kb, kc = jax.random.split(kk, 3)
            w = 0.1 * jax.random.normal(ka, (oc, c_in, 3), jnp.float32)  # (Cout,Cin,3)
            gamma = 1.0 + 0.1 * jax.random.normal(kb, (oc,), jnp.float32)
            beta = 0.1 * jax.random.normal(kc, (oc,), jnp.float32)
            cnn.append({"w": w, "gamma": gamma, "beta": beta})
            c_in = oc
        params["stages"].append({"tr_w": tr_w, "tr_b": tr_b, "cnn": cnn})
        ic //= 2
        oc //= 2
    key, kf1, kf2 = jax.random.split(key, 3)
    params["final_w"] = 0.1 * jax.random.normal(kf1, (exit_channels, ic, 1), jnp.float32)
    params["final_b"] = 0.1 * jax.random.normal(kf2, (exit_channels,), jnp.float32)
    return params


if __name__ == "__main__":
    N = 2
    in_channels, out_channels, exit_channels = 16, 8, 1
    maxpool_kernel_sizes = [2, 2]
    uphill = 2
    L_in = 8

    key = jax.random.PRNGKey(0)
    key, kp, kx, kr0, kr1, kr2 = jax.random.split(key, 6)
    params = init_decoder_params(kp, in_channels, out_channels, exit_channels,
                                 maxpool_kernel_sizes, uphill)
    prep = prepare_decoder_params(params)     # one-time weight packing (hoisted)

    x = jax.random.normal(kx, (N, in_channels, L_in), jnp.float32)
    # routes_connection as the encoder would produce: shallow -> deep (NCL).
    routes = (
        jax.random.normal(kr0, (N, 4, 32), jnp.float32),  # used by stage 1
        jax.random.normal(kr1, (N, 8, 16), jnp.float32),  # used by stage 0
        jax.random.normal(kr2, (N, 16, 8), jnp.float32),  # deepest, popped & unused
    )

    fwd = jax.jit(decoder_forward)
    out = jax.block_until_ready(fwd(prep, x, routes))
    assert out.shape == (N, exit_channels, 32), out.shape
    assert bool(jnp.all(jnp.isfinite(out)))
    print("KERNEL_OK")
</pallas_src>

<mosaic_0001>
module attributes {stable_mosaic.version = 11 : i64} {
  func.func @_decoder_kernel(%arg0: i32, %arg1: memref<2x16x8xf32, #tpu.memory_space<vmem>>, %arg2: memref<2x8x16xf32, #tpu.memory_space<vmem>>, %arg3: memref<16x16xbf16, #tpu.memory_space<vmem>>, %arg4: memref<1x8xf32, #tpu.memory_space<vmem>>, %arg5: memref<16x16xf32, #tpu.memory_space<vmem>>, %arg6: memref<48x8xbf16, #tpu.memory_space<vmem>>, %arg7: memref<1x8xf32, #tpu.memory_space<vmem>>, %arg8: memref<1x8xf32, #tpu.memory_space<vmem>>, %arg9: memref<24x8xbf16, #tpu.memory_space<vmem>>, %arg10: memref<1x8xf32, #tpu.memory_space<vmem>>, %arg11: memref<1x8xf32, #tpu.memory_space<vmem>>, %arg12: memref<2x4x32xf32, #tpu.memory_space<vmem>>, %arg13: memref<8x8xbf16, #tpu.memory_space<vmem>>, %arg14: memref<1x4xf32, #tpu.memory_space<vmem>>, %arg15: memref<32x32xf32, #tpu.memory_space<vmem>>, %arg16: memref<24x4xbf16, #tpu.memory_space<vmem>>, %arg17: memref<1x4xf32, #tpu.memory_space<vmem>>, %arg18: memref<1x4xf32, #tpu.memory_space<vmem>>, %arg19: memref<12x4xbf16, #tpu.memory_space<vmem>>, %arg20: memref<1x4xf32, #tpu.memory_space<vmem>>, %arg21: memref<1x4xf32, #tpu.memory_space<vmem>>, %arg22: memref<1x4xbf16, #tpu.memory_space<vmem>>, %arg23: memref<1x1xf32, #tpu.memory_space<vmem>>, %arg24: memref<2x1x32xf32, #tpu.memory_space<vmem>>) attributes {dimension_semantics = [#tpu.dimension_semantics<arbitrary>], iteration_bounds = array<i64: 1>, scalar_prefetch = 0 : i64, scratch_operands = 0 : i64, tpu.core_type = #tpu.core_type<tc>, window_params = [{pipeline_mode = #tpu.pipeline_mode<synchronous>, transform_indices = @transform_0, window_bounds = array<i64: 2, 16, 8>}, {pipeline_mode = #tpu.pipeline_mode<synchronous>, transform_indices = @transform_1, window_bounds = array<i64: 2, 8, 16>}, {pipeline_mode = #tpu.pipeline_mode<synchronous>, transform_indices = @transform_2, window_bounds = array<i64: 16, 16>}, {pipeline_mode = #tpu.pipeline_mode<synchronous>, transform_indices = @transform_3, window_bounds = array<i64: 1, 8>}, {pipeline_mode = #tpu.pipeline_mode<synchronous>, transform_indices = @transform_4, window_bounds = array<i64: 16, 16>}, {pipeline_mode = #tpu.pipeline_mode<synchronous>, transform_indices = @transform_5, window_bounds = array<i64: 48, 8>}, {pipeline_mode = #tpu.pipeline_mode<synchronous>, transform_indices = @transform_6, window_bounds = array<i64: 1, 8>}, {pipeline_mode = #tpu.pipeline_mode<synchronous>, transform_indices = @transform_7, window_bounds = array<i64: 1, 8>}, {pipeline_mode = #tpu.pipeline_mode<synchronous>, transform_indices = @transform_8, window_bounds = array<i64: 24, 8>}, {pipeline_mode = #tpu.pipeline_mode<synchronous>, transform_indices = @transform_9, window_bounds = array<i64: 1, 8>}, {pipeline_mode = #tpu.pipeline_mode<synchronous>, transform_indices = @transform_10, window_bounds = array<i64: 1, 8>}, {pipeline_mode = #tpu.pipeline_mode<synchronous>, transform_indices = @transform_11, window_bounds = array<i64: 2, 4, 32>}, {pipeline_mode = #tpu.pipeline_mode<synchronous>, transform_indices = @transform_12, window_bounds = array<i64: 8, 8>}, {pipeline_mode = #tpu.pipeline_mode<synchronous>, transform_indices = @transform_13, window_bounds = array<i64: 1, 4>}, {pipeline_mode = #tpu.pipeline_mode<synchronous>, transform_indices = @transform_14, window_bounds = array<i64: 32, 32>}, {pipeline_mode = #tpu.pipeline_mode<synchronous>, transform_indices = @transform_15, window_bounds = array<i64: 24, 4>}, {pipeline_mode = #tpu.pipeline_mode<synchronous>, transform_indices = @transform_16, window_bounds = array<i64: 1, 4>}, {pipeline_mode = #tpu.pipeline_mode<synchronous>, transform_indices = @transform_17, window_bounds = array<i64: 1, 4>}, {pipeline_mode = #tpu.pipeline_mode<synchronous>, transform_indices = @transform_18, window_bounds = array<i64: 12, 4>}, {pipeline_mode = #tpu.pipeline_mode<synchronous>, transform_indices = @transform_19, window_bounds = array<i64: 1, 4>}, {pipeline_mode = #tpu.pipeline_mode<synchronous>, transform_indices = @transform_20, window_bounds = array<i64: 1, 4>}, {pipeline_mode = #tpu.pipeline_mode<synchronous>, transform_indices = @transform_21, window_bounds = array<i64: 1, 4>}, {pipeline_mode = #tpu.pipeline_mode<synchronous>, transform_indices = @transform_22, window_bounds = array<i64: 1, 1>}, {pipeline_mode = #tpu.pipeline_mode<synchronous>, transform_indices = @transform_23, window_bounds = array<i64: 2, 1, 32>}]} {
    %c0 = arith.constant 0 : index
    %c0_0 = arith.constant 0 : index
    %c0_1 = arith.constant 0 : index
    %0 = vector.load %arg1[%c0, %c0_0, %c0_1] : memref<2x16x8xf32, #tpu.memory_space<vmem>>, vector<1x16x8xf32>
    %1 = vector.shape_cast %0 : vector<1x16x8xf32> to vector<16x8xf32>
    %2 = tpu.transpose %1, [1, 0] : vector<16x8xf32> -> vector<8x16xf32>
    %c1 = arith.constant 1 : index
    %c0_2 = arith.constant 0 : index
    %c0_3 = arith.constant 0 : index
    %3 = vector.load %arg1[%c1, %c0_2, %c0_3] : memref<2x16x8xf32, #tpu.memory_space<vmem>>, vector<1x16x8xf32>
    %4 = vector.shape_cast %3 : vector<1x16x8xf32> to vector<16x8xf32>
    %5 = tpu.transpose %4, [1, 0] : vector<16x8xf32> -> vector<8x16xf32>
    %c0_4 = arith.constant 0 : index
    %c0_5 = arith.constant 0 : index
    %6 = vector.load %arg3[%c0_4, %c0_5] : memref<16x16xbf16, #tpu.memory_space<vmem>>, vector<16x16xbf16>
    %c0_6 = arith.constant 0 : index
    %c0_7 = arith.constant 0 : index
    %7 = vector.load %arg4[%c0_6, %c0_7] : memref<1x8xf32, #tpu.memory_space<vmem>>, vector<1x8xf32>
    %c0_8 = arith.constant 0 : index
    %c0_9 = arith.constant 0 : index
    %8 = vector.load %arg5[%c0_8, %c0_9] : memref<16x16xf32, #tpu.memory_space<vmem>>, vector<16x16xf32>
    %c0_10 = arith.constant 0 : index
    %c0_11 = arith.constant 0 : index
    %9 = vector.load %arg6[%c0_10, %c0_11] : memref<48x8xbf16, #tpu.memory_space<vmem>>, vector<48x8xbf16>
    %c0_12 = arith.constant 0 : index
    %c0_13 = arith.constant 0 : index
    %10 = vector.load %arg9[%c0_12, %c0_13] : memref<24x8xbf16, #tpu.memory_space<vmem>>, vector<24x8xbf16>
    %11 = arith.truncf %2 : vector<8x16xf32> to vector<8x16xbf16>
    %cst = arith.constant dense<0.000000e+00> : vector<8x16xf32>
    %12 = tpu.matmul %11, %6, %cst {dimension_numbers = #tpu.dot_dimension_numbers<[1], [0], [0], [1], [0, 0, 1, 1], [], []>} : vector<8x16xbf16>, vector<16x16xbf16>, vector<8x16xf32> -> vector<8x16xf32>
    %13 = vector.extract_strided_slice %12 {offsets = [0, 0], sizes = [8, 8], strides = [1, 1]} : vector<8x16xf32> to vector<8x8xf32>
    %14 = vector.extract_strided_slice %12 {offsets = [0, 8], sizes = [8, 8], strides = [1, 1]} : vector<8x16xf32> to vector<8x8xf32>
    %15 = tpu.concatenate %13, %14 in 0 : vector<8x8xf32>, vector<8x8xf32> -> vector<16x8xf32>
    %cst_14 = arith.constant dense<0.000000e+00> : vector<16x8xf32>
    %16 = tpu.matmul %8, %15, %cst_14 {dimension_numbers = #tpu.dot_dimension_numbers<[1], [0], [0], [1], [0, 0, 1, 1], [], []>} : vector<16x16xf32>, vector<16x8xf32>, vector<16x8xf32> -> vector<16x8xf32>
    %17 = vector.broadcast %7 : vector<1x8xf32> to vector<16x8xf32>
    %18 = arith.addf %16, %17 : vector<16x8xf32>
    %c0_15 = arith.constant 0 : index
    %c0_16 = arith.constant 0 : index
    %c0_17 = arith.constant 0 : index
    %19 = vector.load %arg2[%c0_15, %c0_16, %c0_17] : memref<2x8x16xf32, #tpu.memory_space<vmem>>, vector<1x8x16xf32>
    %20 = vector.shape_cast %19 : vector<1x8x16xf32> to vector<8x16xf32>
    %21 = tpu.transpose %20, [1, 0] : vector<8x16xf32> -> vector<16x8xf32>
    %22 = tpu.concatenate %18, %21 in 1 : vector<16x8xf32>, vector<16x8xf32> -> vector<16x16xf32>
    %cst_18 = arith.constant 0.000000e+00 : f32
    %23 = vector.broadcast %cst_18 : f32 to vector<1x16xf32>
    %24 = vector.extract_strided_slice %22 {offsets = [0, 0], sizes = [15, 16], strides = [1, 1]} : vector<16x16xf32> to vector<15x16xf32>
    %25 = tpu.concatenate %23, %24 in 0 : vector<1x16xf32>, vector<15x16xf32> -> vector<16x16xf32>
    %26 = vector.extract_strided_slice %22 {offsets = [1, 0], sizes = [15, 16], strides = [1, 1]} : vector<16x16xf32> to vector<15x16xf32>
    %27 = tpu.concatenate %26, %23 in 0 : vector<15x16xf32>, vector<1x16xf32> -> vector<16x16xf32>
    %28 = tpu.concatenate %25, %22, %27 in 1 : vector<16x16xf32>, vector<16x16xf32>, vector<16x16xf32> -> vector<16x48xf32>
    %29 = arith.truncf %28 : vector<16x48xf32> to vector<16x48xbf16>
    %cst_19 = arith.constant dense<0.000000e+00> : vector<16x8xf32>
    %30 = tpu.matmul %29, %9, %cst_19 {dimension_numbers = #tpu.dot_dimension_numbers<[1], [0], [0], [1], [0, 0, 1, 1], [], []>} : vector<16x48xbf16>, vector<48x8xbf16>, vector<16x8xf32> -> vector<16x8xf32>
    %cst_20 = arith.constant dense<0.000000e+00> : vector<8xf32>
    %31 = vector.multi_reduction <add>, %30, %cst_20 [0] : vector<16x8xf32> to vector<8xf32>
    %32 = vector.shape_cast %31 : vector<8xf32> to vector<1x8xf32>
    %cst_21 = arith.constant 0.000000e+00 : f32
    %33 = vector.broadcast %cst_21 : f32 to vector<1x8xf32>
    %34 = arith.addf %33, %32 : vector<1x8xf32>
    %35 = arith.mulf %30, %30 : vector<16x8xf32>
    %cst_22 = arith.constant dense<0.000000e+00> : vector<8xf32>
    %36 = vector.multi_reduction <add>, %35, %cst_22 [0] : vector<16x8xf32> to vector<8xf32>
    %37 = vector.shape_cast %36 : vector<8xf32> to vector<1x8xf32>
    %cst_23 = arith.constant 0.000000e+00 : f32
    %38 = vector.broadcast %cst_23 : f32 to vector<1x8xf32>
    %39 = arith.addf %38, %37 : vector<1x8xf32>
    %40 = arith.truncf %5 : vector<8x16xf32> to vector<8x16xbf16>
    %cst_24 = arith.constant dense<0.000000e+00> : vector<8x16xf32>
    %41 = tpu.matmul %40, %6, %cst_24 {dimension_numbers = #tpu.dot_dimension_numbers<[1], [0], [0], [1], [0, 0, 1, 1], [], []>} : vector<8x16xbf16>, vector<16x16xbf16>, vector<8x16xf32> -> vector<8x16xf32>
    %42 = vector.extract_strided_slice %41 {offsets = [0, 0], sizes = [8, 8], strides = [1, 1]} : vector<8x16xf32> to vector<8x8xf32>
    %43 = vector.extract_strided_slice %41 {offsets = [0, 8], sizes = [8, 8], strides = [1, 1]} : vector<8x16xf32> to vector<8x8xf32>
    %44 = tpu.concatenate %42, %43 in 0 : vector<8x8xf32>, vector<8x8xf32> -> vector<16x8xf32>
    %cst_25 = arith.constant dense<0.000000e+00> : vector<16x8xf32>
    %45 = tpu.matmul %8, %44, %cst_25 {dimension_numbers = #tpu.dot_dimension_numbers<[1], [0], [0], [1], [0, 0, 1, 1], [], []>} : vector<16x16xf32>, vector<16x8xf32>, vector<16x8xf32> -> vector<16x8xf32>
    %46 = vector.broadcast %7 : vector<1x8xf32> to vector<16x8xf32>
    %47 = arith.addf %45, %46 : vector<16x8xf32>
    %c1_26 = arith.constant 1 : index
    %c0_27 = arith.constant 0 : index
    %c0_28 = arith.constant 0 : index
    %48 = vector.load %arg2[%c1_26, %c0_27, %c0_28] : memref<2x8x16xf32, #tpu.memory_space<vmem>>, vector<1x8x16xf32>
    %49 = vector.shape_cast %48 : vector<1x8x16xf32> to vector<8x16xf32>
    %50 = tpu.transpose %49, [1, 0] : vector<8x16xf32> -> vector<16x8xf32>
    %51 = tpu.concatenate %47, %50 in 1 : vector<16x8xf32>, vector<16x8xf32> -> vector<16x16xf32>
    %cst_29 = arith.constant 0.000000e+00 : f32
    %52 = vector.broadcast %cst_29 : f32 to vector<1x16xf32>
    %53 = vector.extract_strided_slice %51 {offsets = [0, 0], sizes = [15, 16], strides = [1, 1]} : vector<16x16xf32> to vector<15x16xf32>
    %54 = tpu.concatenate %52, %53 in 0 : vector<1x16xf32>, vector<15x16xf32> -> vector<16x16xf32>
    %55 = vector.extract_strided_slice %51 {offsets = [1, 0], sizes = [15, 16], strides = [1, 1]} : vector<16x16xf32> to vector<15x16xf32>
    %56 = tpu.concatenate %55, %52 in 0 : vector<15x16xf32>, vector<1x16xf32> -> vector<16x16xf32>
    %57 = tpu.concatenate %54, %51, %56 in 1 : vector<16x16xf32>, vector<16x16xf32>, vector<16x16xf32> -> vector<16x48xf32>
    %58 = arith.truncf %57 : vector<16x48xf32> to vector<16x48xbf16>
    %cst_30 = arith.constant dense<0.000000e+00> : vector<16x8xf32>
    %59 = tpu.matmul %58, %9, %cst_30 {dimension_numbers = #tpu.dot_dimension_numbers<[1], [0], [0], [1], [0, 0, 1, 1], [], []>} : vector<16x48xbf16>, vector<48x8xbf16>, vector<16x8xf32> -> vector<16x8xf32>
    %cst_31 = arith.constant dense<0.000000e+00> : vector<8xf32>
    %60 = vector.multi_reduction <add>, %59, %cst_31 [0] : vector<16x8xf32> to vector<8xf32>
    %61 = vector.shape_cast %60 : vector<8xf32> to vector<1x8xf32>
    %62 = arith.addf %34, %61 : vector<1x8xf32>
    %63 = arith.mulf %59, %59 : vector<16x8xf32>
    %cst_32 = arith.constant dense<0.000000e+00> : vector<8xf32>
    %64 = vector.multi_reduction <add>, %63, %cst_32 [0] : vector<16x8xf32> to vector<8xf32>
    %65 = vector.shape_cast %64 : vector<8xf32> to vector<1x8xf32>
    %66 = arith.addf %39, %65 : vector<1x8xf32>
    %c0_33 = arith.constant 0 : index
    %c0_34 = arith.constant 0 : index
    %67 = vector.load %arg7[%c0_33, %c0_34] : memref<1x8xf32, #tpu.memory_space<vmem>>, vector<1x8xf32>
    %c0_35 = arith.constant 0 : index
    %c0_36 = arith.constant 0 : index
    %68 = vector.load %arg8[%c0_35, %c0_36] : memref<1x8xf32, #tpu.memory_space<vmem>>, vector<1x8xf32>
    %cst_37 = arith.constant 3.200000e+01 : f32
    %69 = vector.broadcast %cst_37 : f32 to vector<1x8xf32>
    %70 = arith.divf %62, %69 : vector<1x8xf32>
    %cst_38 = arith.constant 3.200000e+01 : f32
    %71 = vector.broadcast %cst_38 : f32 to vector<1x8xf32>
    %72 = arith.divf %66, %71 : vector<1x8xf32>
    %73 = arith.mulf %70, %70 : vector<1x8xf32>
    %74 = arith.subf %72, %73 : vector<1x8xf32>
    %cst_39 = arith.constant 0.000000e+00 : f32
    %75 = vector.broadcast %cst_39 : f32 to vector<1x8xf32>
    %76 = arith.maximumf %74, %75 : vector<1x8xf32>
    %cst_40 = arith.constant 9.99999974E-6 : f32
    %77 = vector.broadcast %cst_40 : f32 to vector<1x8xf32>
    %78 = arith.addf %76, %77 : vector<1x8xf32>
    %79 = math.rsqrt %78 : vector<1x8xf32>
    %80 = arith.mulf %67, %79 : vector<1x8xf32>
    %81 = arith.mulf %70, %80 : vector<1x8xf32>
    %82 = arith.subf %68, %81 : vector<1x8xf32>
    %83 = vector.broadcast %80 : vector<1x8xf32> to vector<16x8xf32>
    %84 = arith.mulf %30, %83 : vector<16x8xf32>
    %85 = vector.broadcast %82 : vector<1x8xf32> to vector<16x8xf32>
    %86 = arith.addf %84, %85 : vector<16x8xf32>
    %cst_41 = arith.constant 0.000000e+00 : f32
    %87 = vector.broadcast %cst_41 : f32 to vector<16x8xf32>
    %88 = arith.maximumf %86, %87 : vector<16x8xf32>
    %cst_42 = arith.constant 0.000000e+00 : f32
    %89 = vector.broadcast %cst_42 : f32 to vector<1x8xf32>
    %90 = vector.extract_strided_slice %88 {offsets = [0, 0], sizes = [15, 8], strides = [1, 1]} : vector<16x8xf32> to vector<15x8xf32>
    %91 = tpu.concatenate %89, %90 in 0 : vector<1x8xf32>, vector<15x8xf32> -> vector<16x8xf32>
    %92 = vector.extract_strided_slice %88 {offsets = [1, 0], sizes = [15, 8], strides = [1, 1]} : vector<16x8xf32> to vector<15x8xf32>
    %93 = tpu.concatenate %92, %89 in 0 : vector<15x8xf32>, vector<1x8xf32> -> vector<16x8xf32>
    %94 = tpu.concatenate %91, %88, %93 in 1 : vector<16x8xf32>, vector<16x8xf32>, vector<16x8xf32> -> vector<16x24xf32>
    %95 = arith.truncf %94 : vector<16x24xf32> to vector<16x24xbf16>
    %cst_43 = arith.constant dense<0.000000e+00> : vector<16x8xf32>
    %96 = tpu.matmul %95, %10, %cst_43 {dimension_numbers = #tpu.dot_dimension_numbers<[1], [0], [0], [1], [0, 0, 1, 1], [], []>} : vector<16x24xbf16>, vector<24x8xbf16>, vector<16x8xf32> -> vector<16x8xf32>
    %cst_44 = arith.constant dense<0.000000e+00> : vector<8xf32>
    %97 = vector.multi_reduction <add>, %96, %cst_44 [0] : vector<16x8xf32> to vector<8xf32>
    %98 = vector.shape_cast %97 : vector<8xf32> to vector<1x8xf32>
    %cst_45 = arith.constant 0.000000e+00 : f32
    %99 = vector.broadcast %cst_45 : f32 to vector<1x8xf32>
    %100 = arith.addf %99, %98 : vector<1x8xf32>
    %101 = arith.mulf %96, %96 : vector<16x8xf32>
    %cst_46 = arith.constant dense<0.000000e+00> : vector<8xf32>
    %102 = vector.multi_reduction <add>, %101, %cst_46 [0] : vector<16x8xf32> to vector<8xf32>
    %103 = vector.shape_cast %102 : vector<8xf32> to vector<1x8xf32>
    %cst_47 = arith.constant 0.000000e+00 : f32
    %104 = vector.broadcast %cst_47 : f32 to vector<1x8xf32>
    %105 = arith.addf %104, %103 : vector<1x8xf32>
    %106 = vector.broadcast %80 : vector<1x8xf32> to vector<16x8xf32>
    %107 = arith.mulf %59, %106 : vector<16x8xf32>
    %108 = vector.broadcast %82 : vector<1x8xf32> to vector<16x8xf32>
    %109 = arith.addf %107, %108 : vector<16x8xf32>
    %cst_48 = arith.constant 0.000000e+00 : f32
    %110 = vector.broadcast %cst_48 : f32 to vector<16x8xf32>
    %111 = arith.maximumf %109, %110 : vector<16x8xf32>
    %cst_49 = arith.constant 0.000000e+00 : f32
    %112 = vector.broadcast %cst_49 : f32 to vector<1x8xf32>
    %113 = vector.extract_strided_slice %111 {offsets = [0, 0], sizes = [15, 8], strides = [1, 1]} : vector<16x8xf32> to vector<15x8xf32>
    %114 = tpu.concatenate %112, %113 in 0 : vector<1x8xf32>, vector<15x8xf32> -> vector<16x8xf32>
    %115 = vector.extract_strided_slice %111 {offsets = [1, 0], sizes = [15, 8], strides = [1, 1]} : vector<16x8xf32> to vector<15x8xf32>
    %116 = tpu.concatenate %115, %112 in 0 : vector<15x8xf32>, vector<1x8xf32> -> vector<16x8xf32>
    %117 = tpu.concatenate %114, %111, %116 in 1 : vector<16x8xf32>, vector<16x8xf32>, vector<16x8xf32> -> vector<16x24xf32>
    %118 = arith.truncf %117 : vector<16x24xf32> to vector<16x24xbf16>
    %cst_50 = arith.constant dense<0.000000e+00> : vector<16x8xf32>
    %119 = tpu.matmul %118, %10, %cst_50 {dimension_numbers = #tpu.dot_dimension_numbers<[1], [0], [0], [1], [0, 0, 1, 1], [], []>} : vector<16x24xbf16>, vector<24x8xbf16>, vector<16x8xf32> -> vector<16x8xf32>
    %cst_51 = arith.constant dense<0.000000e+00> : vector<8xf32>
    %120 = vector.multi_reduction <add>, %119, %cst_51 [0] : vector<16x8xf32> to vector<8xf32>
    %121 = vector.shape_cast %120 : vector<8xf32> to vector<1x8xf32>
    %122 = arith.addf %100, %121 : vector<1x8xf32>
    %123 = arith.mulf %119, %119 : vector<16x8xf32>
    %cst_52 = arith.constant dense<0.000000e+00> : vector<8xf32>
    %124 = vector.multi_reduction <add>, %123, %cst_52 [0] : vector<16x8xf32> to vector<8xf32>
    %125 = vector.shape_cast %124 : vector<8xf32> to vector<1x8xf32>
    %126 = arith.addf %105, %125 : vector<1x8xf32>
    %c0_53 = arith.constant 0 : index
    %c0_54 = arith.constant 0 : index
    %127 = vector.load %arg10[%c0_53, %c0_54] : memref<1x8xf32, #tpu.memory_space<vmem>>, vector<1x8xf32>
    %c0_55 = arith.constant 0 : index
    %c0_56 = arith.constant 0 : index
    %128 = vector.load %arg11[%c0_55, %c0_56] : memref<1x8xf32, #tpu.memory_space<vmem>>, vector<1x8xf32>
    %cst_57 = arith.constant 3.200000e+01 : f32
    %129 = vector.broadcast %cst_57 : f32 to vector<1x8xf32>
    %130 = arith.divf %122, %129 : vector<1x8xf32>
    %cst_58 = arith.constant 3.200000e+01 : f32
    %131 = vector.broadcast %cst_58 : f32 to vector<1x8xf32>
    %132 = arith.divf %126, %131 : vector<1x8xf32>
    %133 = arith.mulf %130, %130 : vector<1x8xf32>
    %134 = arith.subf %132, %133 : vector<1x8xf32>
    %cst_59 = arith.constant 0.000000e+00 : f32
    %135 = vector.broadcast %cst_59 : f32 to vector<1x8xf32>
    %136 = arith.maximumf %134, %135 : vector<1x8xf32>
    %cst_60 = arith.constant 9.99999974E-6 : f32
    %137 = vector.broadcast %cst_60 : f32 to vector<1x8xf32>
    %138 = arith.addf %136, %137 : vector<1x8xf32>
    %139 = math.rsqrt %138 : vector<1x8xf32>
    %140 = arith.mulf %127, %139 : vector<1x8xf32>
    %141 = arith.mulf %130, %140 : vector<1x8xf32>
    %142 = arith.subf %128, %141 : vector<1x8xf32>
    %143 = vector.broadcast %140 : vector<1x8xf32> to vector<16x8xf32>
    %144 = arith.mulf %96, %143 : vector<16x8xf32>
    %145 = vector.broadcast %142 : vector<1x8xf32> to vector<16x8xf32>
    %146 = arith.addf %144, %145 : vector<16x8xf32>
    %cst_61 = arith.constant 0.000000e+00 : f32
    %147 = vector.broadcast %cst_61 : f32 to vector<16x8xf32>
    %148 = arith.maximumf %146, %147 : vector<16x8xf32>
    %149 = vector.broadcast %140 : vector<1x8xf32> to vector<16x8xf32>
    %150 = arith.mulf %119, %149 : vector<16x8xf32>
    %151 = vector.broadcast %142 : vector<1x8xf32> to vector<16x8xf32>
    %152 = arith.addf %150, %151 : vector<16x8xf32>
    %cst_62 = arith.constant 0.000000e+00 : f32
    %153 = vector.broadcast %cst_62 : f32 to vector<16x8xf32>
    %154 = arith.maximumf %152, %153 : vector<16x8xf32>
    %c0_63 = arith.constant 0 : index
    %c0_64 = arith.constant 0 : index
    %155 = vector.load %arg13[%c0_63, %c0_64] : memref<8x8xbf16, #tpu.memory_space<vmem>>, vector<8x8xbf16>
    %c0_65 = arith.constant 0 : index
    %c0_66 = arith.constant 0 : index
    %156 = vector.load %arg14[%c0_65, %c0_66] : memref<1x4xf32, #tpu.memory_space<vmem>>, vector<1x4xf32>
    %c0_67 = arith.constant 0 : index
    %c0_68 = arith.constant 0 : index
    %157 = vector.load %arg15[%c0_67, %c0_68] : memref<32x32xf32, #tpu.memory_space<vmem>>, vector<32x32xf32>
    %c0_69 = arith.constant 0 : index
    %c0_70 = arith.constant 0 : index
    %158 = vector.load %arg16[%c0_69, %c0_70] : memref<24x4xbf16, #tpu.memory_space<vmem>>, vector<24x4xbf16>
    %c0_71 = arith.constant 0 : index
    %c0_72 = arith.constant 0 : index
    %159 = vector.load %arg19[%c0_71, %c0_72] : memref<12x4xbf16, #tpu.memory_space<vmem>>, vector<12x4xbf16>
    %160 = arith.truncf %148 : vector<16x8xf32> to vector<16x8xbf16>
    %cst_73 = arith.constant dense<0.000000e+00> : vector<16x8xf32>
    %161 = tpu.matmul %160, %155, %cst_73 {dimension_numbers = #tpu.dot_dimension_numbers<[1], [0], [0], [1], [0, 0, 1, 1], [], []>} : vector<16x8xbf16>, vector<8x8xbf16>, vector<16x8xf32> -> vector<16x8xf32>
    %162 = vector.extract_strided_slice %161 {offsets = [0, 0], sizes = [16, 4], strides = [1, 1]} : vector<16x8xf32> to vector<16x4xf32>
    %163 = vector.extract_strided_slice %161 {offsets = [0, 4], sizes = [16, 4], strides = [1, 1]} : vector<16x8xf32> to vector<16x4xf32>
    %164 = tpu.concatenate %162, %163 in 0 : vector<16x4xf32>, vector<16x4xf32> -> vector<32x4xf32>
    %cst_74 = arith.constant dense<0.000000e+00> : vector<32x4xf32>
    %165 = tpu.matmul %157, %164, %cst_74 {dimension_numbers = #tpu.dot_dimension_numbers<[1], [0], [0], [1], [0, 0, 1, 1], [], []>} : vector<32x32xf32>, vector<32x4xf32>, vector<32x4xf32> -> vector<32x4xf32>
    %166 = vector.broadcast %156 : vector<1x4xf32> to vector<32x4xf32>
    %167 = arith.addf %165, %166 : vector<32x4xf32>
    %c0_75 = arith.constant 0 : index
    %c0_76 = arith.constant 0 : index
    %c0_77 = arith.constant 0 : index
    %168 = vector.load %arg12[%c0_75, %c0_76, %c0_77] : memref<2x4x32xf32, #tpu.memory_space<vmem>>, vector<1x4x32xf32>
    %169 = vector.shape_cast %168 : vector<1x4x32xf32> to vector<4x32xf32>
    %170 = tpu.transpose %169, [1, 0] : vector<4x32xf32> -> vector<32x4xf32>
    %171 = tpu.concatenate %167, %170 in 1 : vector<32x4xf32>, vector<32x4xf32> -> vector<32x8xf32>
    %cst_78 = arith.constant 0.000000e+00 : f32
    %172 = vector.broadcast %cst_78 : f32 to vector<1x8xf32>
    %173 = vector.extract_strided_slice %171 {offsets = [0, 0], sizes = [31, 8], strides = [1, 1]} : vector<32x8xf32> to vector<31x8xf32>
    %174 = tpu.concatenate %172, %173 in 0 : vector<1x8xf32>, vector<31x8xf32> -> vector<32x8xf32>
    %175 = vector.extract_strided_slice %171 {offsets = [1, 0], sizes = [31, 8], strides = [1, 1]} : vector<32x8xf32> to vector<31x8xf32>
    %176 = tpu.concatenate %175, %172 in 0 : vector<31x8xf32>, vector<1x8xf32> -> vector<32x8xf32>
    %177 = tpu.concatenate %174, %171, %176 in 1 : vector<32x8xf32>, vector<32x8xf32>, vector<32x8xf32> -> vector<32x24xf32>
    %178 = arith.truncf %177 : vector<32x24xf32> to vector<32x24xbf16>
    %cst_79 = arith.constant dense<0.000000e+00> : vector<32x4xf32>
    %179 = tpu.matmul %178, %158, %cst_79 {dimension_numbers = #tpu.dot_dimension_numbers<[1], [0], [0], [1], [0, 0, 1, 1], [], []>} : vector<32x24xbf16>, vector<24x4xbf16>, vector<32x4xf32> -> vector<32x4xf32>
    %cst_80 = arith.constant dense<0.000000e+00> : vector<4xf32>
    %180 = vector.multi_reduction <add>, %179, %cst_80 [0] : vector<32x4xf32> to vector<4xf32>
    %181 = vector.shape_cast %180 : vector<4xf32> to vector<1x4xf32>
    %cst_81 = arith.constant 0.000000e+00 : f32
    %182 = vector.broadcast %cst_81 : f32 to vector<1x4xf32>
    %183 = arith.addf %182, %181 : vector<1x4xf32>
    %184 = arith.mulf %179, %179 : vector<32x4xf32>
    %cst_82 = arith.constant dense<0.000000e+00> : vector<4xf32>
    %185 = vector.multi_reduction <add>, %184, %cst_82 [0] : vector<32x4xf32> to vector<4xf32>
    %186 = vector.shape_cast %185 : vector<4xf32> to vector<1x4xf32>
    %cst_83 = arith.constant 0.000000e+00 : f32
    %187 = vector.broadcast %cst_83 : f32 to vector<1x4xf32>
    %188 = arith.addf %187, %186 : vector<1x4xf32>
    %189 = arith.truncf %154 : vector<16x8xf32> to vector<16x8xbf16>
    %cst_84 = arith.constant dense<0.000000e+00> : vector<16x8xf32>
    %190 = tpu.matmul %189, %155, %cst_84 {dimension_numbers = #tpu.dot_dimension_numbers<[1], [0], [0], [1], [0, 0, 1, 1], [], []>} : vector<16x8xbf16>, vector<8x8xbf16>, vector<16x8xf32> -> vector<16x8xf32>
    %191 = vector.extract_strided_slice %190 {offsets = [0, 0], sizes = [16, 4], strides = [1, 1]} : vector<16x8xf32> to vector<16x4xf32>
    %192 = vector.extract_strided_slice %190 {offsets = [0, 4], sizes = [16, 4], strides = [1, 1]} : vector<16x8xf32> to vector<16x4xf32>
    %193 = tpu.concatenate %191, %192 in 0 : vector<16x4xf32>, vector<16x4xf32> -> vector<32x4xf32>
    %cst_85 = arith.constant dense<0.000000e+00> : vector<32x4xf32>
    %194 = tpu.matmul %157, %193, %cst_85 {dimension_numbers = #tpu.dot_dimension_numbers<[1], [0], [0], [1], [0, 0, 1, 1], [], []>} : vector<32x32xf32>, vector<32x4xf32>, vector<32x4xf32> -> vector<32x4xf32>
    %195 = vector.broadcast %156 : vector<1x4xf32> to vector<32x4xf32>
    %196 = arith.addf %194, %195 : vector<32x4xf32>
    %c1_86 = arith.constant 1 : index
    %c0_87 = arith.constant 0 : index
    %c0_88 = arith.constant 0 : index
    %197 = vector.load %arg12[%c1_86, %c0_87, %c0_88] : memref<2x4x32xf32, #tpu.memory_space<vmem>>, vector<1x4x32xf32>
    %198 = vector.shape_cast %197 : vector<1x4x32xf32> to vector<4x32xf32>
    %199 = tpu.transpose %198, [1, 0] : vector<4x32xf32> -> vector<32x4xf32>
    %200 = tpu.concatenate %196, %199 in 1 : vector<32x4xf32>, vector<32x4xf32> -> vector<32x8xf32>
    %cst_89 = arith.constant 0.000000e+00 : f32
    %201 = vector.broadcast %cst_89 : f32 to vector<1x8xf32>
    %202 = vector.extract_strided_slice %200 {offsets = [0, 0], sizes = [31, 8], strides = [1, 1]} : vector<32x8xf32> to vector<31x8xf32>
    %203 = tpu.concatenate %201, %202 in 0 : vector<1x8xf32>, vector<31x8xf32> -> vector<32x8xf32>
    %204 = vector.extract_strided_slice %200 {offsets = [1, 0], sizes = [31, 8], strides = [1, 1]} : vector<32x8xf32> to vector<31x8xf32>
    %205 = tpu.concatenate %204, %201 in 0 : vector<31x8xf32>, vector<1x8xf32> -> vector<32x8xf32>
    %206 = tpu.concatenate %203, %200, %205 in 1 : vector<32x8xf32>, vector<32x8xf32>, vector<32x8xf32> -> vector<32x24xf32>
    %207 = arith.truncf %206 : vector<32x24xf32> to vector<32x24xbf16>
    %cst_90 = arith.constant dense<0.000000e+00> : vector<32x4xf32>
    %208 = tpu.matmul %207, %158, %cst_90 {dimension_numbers = #tpu.dot_dimension_numbers<[1], [0], [0], [1], [0, 0, 1, 1], [], []>} : vector<32x24xbf16>, vector<24x4xbf16>, vector<32x4xf32> -> vector<32x4xf32>
    %cst_91 = arith.constant dense<0.000000e+00> : vector<4xf32>
    %209 = vector.multi_reduction <add>, %208, %cst_91 [0] : vector<32x4xf32> to vector<4xf32>
    %210 = vector.shape_cast %209 : vector<4xf32> to vector<1x4xf32>
    %211 = arith.addf %183, %210 : vector<1x4xf32>
    %212 = arith.mulf %208, %208 : vector<32x4xf32>
    %cst_92 = arith.constant dense<0.000000e+00> : vector<4xf32>
    %213 = vector.multi_reduction <add>, %212, %cst_92 [0] : vector<32x4xf32> to vector<4xf32>
    %214 = vector.shape_cast %213 : vector<4xf32> to vector<1x4xf32>
    %215 = arith.addf %188, %214 : vector<1x4xf32>
    %c0_93 = arith.constant 0 : index
    %c0_94 = arith.constant 0 : index
    %216 = vector.load %arg17[%c0_93, %c0_94] : memref<1x4xf32, #tpu.memory_space<vmem>>, vector<1x4xf32>
    %c0_95 = arith.constant 0 : index
    %c0_96 = arith.constant 0 : index
    %217 = vector.load %arg18[%c0_95, %c0_96] : memref<1x4xf32, #tpu.memory_space<vmem>>, vector<1x4xf32>
    %cst_97 = arith.constant 6.400000e+01 : f32
    %218 = vector.broadcast %cst_97 : f32 to vector<1x4xf32>
    %219 = arith.divf %211, %218 : vector<1x4xf32>
    %cst_98 = arith.constant 6.400000e+01 : f32
    %220 = vector.broadcast %cst_98 : f32 to vector<1x4xf32>
    %221 = arith.divf %215, %220 : vector<1x4xf32>
    %222 = arith.mulf %219, %219 : vector<1x4xf32>
    %223 = arith.subf %221, %222 : vector<1x4xf32>
    %cst_99 = arith.constant 0.000000e+00 : f32
    %224 = vector.broadcast %cst_99 : f32 to vector<1x4xf32>
    %225 = arith.maximumf %223, %224 : vector<1x4xf32>
    %cst_100 = arith.constant 9.99999974E-6 : f32
    %226 = vector.broadcast %cst_100 : f32 to vector<1x4xf32>
    %227 = arith.addf %225, %226 : vector<1x4xf32>
    %228 = math.rsqrt %227 : vector<1x4xf32>
    %229 = arith.mulf %216, %228 : vector<1x4xf32>
    %230 = arith.mulf %219, %229 : vector<1x4xf32>
    %231 = arith.subf %217, %230 : vector<1x4xf32>
    %232 = vector.broadcast %229 : vector<1x4xf32> to vector<32x4xf32>
    %233 = arith.mulf %179, %232 : vector<32x4xf32>
    %234 = vector.broadcast %231 : vector<1x4xf32> to vector<32x4xf32>
    %235 = arith.addf %233, %234 : vector<32x4xf32>
    %cst_101 = arith.constant 0.000000e+00 : f32
    %236 = vector.broadcast %cst_101 : f32 to vector<32x4xf32>
    %237 = arith.maximumf %235, %236 : vector<32x4xf32>
    %cst_102 = arith.constant 0.000000e+00 : f32
    %238 = vector.broadcast %cst_102 : f32 to vector<1x4xf32>
    %239 = vector.extract_strided_slice %237 {offsets = [0, 0], sizes = [31, 4], strides = [1, 1]} : vector<32x4xf32> to vector<31x4xf32>
    %240 = tpu.concatenate %238, %239 in 0 : vector<1x4xf32>, vector<31x4xf32> -> vector<32x4xf32>
    %241 = vector.extract_strided_slice %237 {offsets = [1, 0], sizes = [31, 4], strides = [1, 1]} : vector<32x4xf32> to vector<31x4xf32>
    %242 = tpu.concatenate %241, %238 in 0 : vector<31x4xf32>, vector<1x4xf32> -> vector<32x4xf32>
    %243 = tpu.concatenate %240, %237, %242 in 1 : vector<32x4xf32>, vector<32x4xf32>, vector<32x4xf32> -> vector<32x12xf32>
    %244 = arith.truncf %243 : vector<32x12xf32> to vector<32x12xbf16>
    %cst_103 = arith.constant dense<0.000000e+00> : vector<32x4xf32>
    %245 = tpu.matmul %244, %159, %cst_103 {dimension_numbers = #tpu.dot_dimension_numbers<[1], [0], [0], [1], [0, 0, 1, 1], [], []>} : vector<32x12xbf16>, vector<12x4xbf16>, vector<32x4xf32> -> vector<32x4xf32>
    %cst_104 = arith.constant dense<0.000000e+00> : vector<4xf32>
    %246 = vector.multi_reduction <add>, %245, %cst_104 [0] : vector<32x4xf32> to vector<4xf32>
    %247 = vector.shape_cast %246 : vector<4xf32> to vector<1x4xf32>
    %cst_105 = arith.constant 0.000000e+00 : f32
    %248 = vector.broadcast %cst_105 : f32 to vector<1x4xf32>
    %249 = arith.addf %248, %247 : vector<1x4xf32>
    %250 = arith.mulf %245, %245 : vector<32x4xf32>
    %cst_106 = arith.constant dense<0.000000e+00> : vector<4xf32>
    %251 = vector.multi_reduction <add>, %250, %cst_106 [0] : vector<32x4xf32> to vector<4xf32>
    %252 = vector.shape_cast %251 : vector<4xf32> to vector<1x4xf32>
    %cst_107 = arith.constant 0.000000e+00 : f32
    %253 = vector.broadcast %cst_107 : f32 to vector<1x4xf32>
    %254 = arith.addf %253, %252 : vector<1x4xf32>
    %255 = vector.broadcast %229 : vector<1x4xf32> to vector<32x4xf32>
    %256 = arith.mulf %208, %255 : vector<32x4xf32>
    %257 = vector.broadcast %231 : vector<1x4xf32> to vector<32x4xf32>
    %258 = arith.addf %256, %257 : vector<32x4xf32>
    %cst_108 = arith.constant 0.000000e+00 : f32
    %259 = vector.broadcast %cst_108 : f32 to vector<32x4xf32>
    %260 = arith.maximumf %258, %259 : vector<32x4xf32>
    %cst_109 = arith.constant 0.000000e+00 : f32
    %261 = vector.broadcast %cst_109 : f32 to vector<1x4xf32>
    %262 = vector.extract_strided_slice %260 {offsets = [0, 0], sizes = [31, 4], strides = [1, 1]} : vector<32x4xf32> to vector<31x4xf32>
    %263 = tpu.concatenate %261, %262 in 0 : vector<1x4xf32>, vector<31x4xf32> -> vector<32x4xf32>
    %264 = vector.extract_strided_slice %260 {offsets = [1, 0], sizes = [31, 4], strides = [1, 1]} : vector<32x4xf32> to vector<31x4xf32>
    %265 = tpu.concatenate %264, %261 in 0 : vector<31x4xf32>, vector<1x4xf32> -> vector<32x4xf32>
    %266 = tpu.concatenate %263, %260, %265 in 1 : vector<32x4xf32>, vector<32x4xf32>, vector<32x4xf32> -> vector<32x12xf32>
    %267 = arith.truncf %266 : vector<32x12xf32> to vector<32x12xbf16>
    %cst_110 = arith.constant dense<0.000000e+00> : vector<32x4xf32>
    %268 = tpu.matmul %267, %159, %cst_110 {dimension_numbers = #tpu.dot_dimension_numbers<[1], [0], [0], [1], [0, 0, 1, 1], [], []>} : vector<32x12xbf16>, vector<12x4xbf16>, vector<32x4xf32> -> vector<32x4xf32>
    %cst_111 = arith.constant dense<0.000000e+00> : vector<4xf32>
    %269 = vector.multi_reduction <add>, %268, %cst_111 [0] : vector<32x4xf32> to vector<4xf32>
    %270 = vector.shape_cast %269 : vector<4xf32> to vector<1x4xf32>
    %271 = arith.addf %249, %270 : vector<1x4xf32>
    %272 = arith.mulf %268, %268 : vector<32x4xf32>
    %cst_112 = arith.constant dense<0.000000e+00> : vector<4xf32>
    %273 = vector.multi_reduction <add>, %272, %cst_112 [0] : vector<32x4xf32> to vector<4xf32>
    %274 = vector.shape_cast %273 : vector<4xf32> to vector<1x4xf32>
    %275 = arith.addf %254, %274 : vector<1x4xf32>
    %c0_113 = arith.constant 0 : index
    %c0_114 = arith.constant 0 : index
    %276 = vector.load %arg20[%c0_113, %c0_114] : memref<1x4xf32, #tpu.memory_space<vmem>>, vector<1x4xf32>
    %c0_115 = arith.constant 0 : index
    %c0_116 = arith.constant 0 : index
    %277 = vector.load %arg21[%c0_115, %c0_116] : memref<1x4xf32, #tpu.memory_space<vmem>>, vector<1x4xf32>
    %cst_117 = arith.constant 6.400000e+01 : f32
    %278 = vector.broadcast %cst_117 : f32 to vector<1x4xf32>
    %279 = arith.divf %271, %278 : vector<1x4xf32>
    %cst_118 = arith.constant 6.400000e+01 : f32
    %280 = vector.broadcast %cst_118 : f32 to vector<1x4xf32>
    %281 = arith.divf %275, %280 : vector<1x4xf32>
    %282 = arith.mulf %279, %279 : vector<1x4xf32>
    %283 = arith.subf %281, %282 : vector<1x4xf32>
    %cst_119 = arith.constant 0.000000e+00 : f32
    %284 = vector.broadcast %cst_119 : f32 to vector<1x4xf32>
    %285 = arith.maximumf %283, %284 : vector<1x4xf32>
    %cst_120 = arith.constant 9.99999974E-6 : f32
    %286 = vector.broadcast %cst_120 : f32 to vector<1x4xf32>
    %287 = arith.addf %285, %286 : vector<1x4xf32>
    %288 = math.rsqrt %287 : vector<1x4xf32>
    %289 = arith.mulf %276, %288 : vector<1x4xf32>
    %290 = arith.mulf %279, %289 : vector<1x4xf32>
    %291 = arith.subf %277, %290 : vector<1x4xf32>
    %292 = vector.broadcast %289 : vector<1x4xf32> to vector<32x4xf32>
    %293 = arith.mulf %245, %292 : vector<32x4xf32>
    %294 = vector.broadcast %291 : vector<1x4xf32> to vector<32x4xf32>
    %295 = arith.addf %293, %294 : vector<32x4xf32>
    %cst_121 = arith.constant 0.000000e+00 : f32
    %296 = vector.broadcast %cst_121 : f32 to vector<32x4xf32>
    %297 = arith.maximumf %295, %296 : vector<32x4xf32>
    %298 = vector.broadcast %289 : vector<1x4xf32> to vector<32x4xf32>
    %299 = arith.mulf %268, %298 : vector<32x4xf32>
    %300 = vector.broadcast %291 : vector<1x4xf32> to vector<32x4xf32>
    %301 = arith.addf %299, %300 : vector<32x4xf32>
    %cst_122 = arith.constant 0.000000e+00 : f32
    %302 = vector.broadcast %cst_122 : f32 to vector<32x4xf32>
    %303 = arith.maximumf %301, %302 : vector<32x4xf32>
    %c0_123 = arith.constant 0 : index
    %c0_124 = arith.constant 0 : index
    %304 = vector.load %arg22[%c0_123, %c0_124] : memref<1x4xbf16, #tpu.memory_space<vmem>>, vector<1x4xbf16>
    %c0_125 = arith.constant 0 : index
    %c0_126 = arith.constant 0 : index
    %305 = vector.load %arg23[%c0_125, %c0_126] : memref<1x1xf32, #tpu.memory_space<vmem>>, vector<1x1xf32>
    %306 = arith.truncf %297 : vector<32x4xf32> to vector<32x4xbf16>
    %cst_127 = arith.constant dense<0.000000e+00> : vector<1x32xf32>
    %307 = tpu.matmul %304, %306, %cst_127 {dimension_numbers = #tpu.dot_dimension_numbers<[1], [1], [0], [0], [0, 0, 1, 0], [], []>} : vector<1x4xbf16>, vector<32x4xbf16>, vector<1x32xf32> -> vector<1x32xf32>
    %308 = vector.broadcast %305 : vector<1x1xf32> to vector<1x32xf32>
    %309 = arith.addf %307, %308 : vector<1x32xf32>
    %c0_128 = arith.constant 0 : index
    %c0_129 = arith.constant 0 : index
    %c0_130 = arith.constant 0 : index
    %310 = vector.load %arg24[%c0_128, %c0_129, %c0_130] : memref<2x1x32xf32, #tpu.memory_space<vmem>>, vector<1x1x32xf32>
    %311 = vector.shape_cast %310 : vector<1x1x32xf32> to vector<1x32xf32>
    %312 = vector.shape_cast %309 : vector<1x32xf32> to vector<1x1x32xf32>
    tpu.vector_store %arg24[%c0_128, %c0_129, %c0_130], %312 {strides = array<i32>} : memref<2x1x32xf32, #tpu.memory_space<vmem>>, vector<1x1x32xf32>,
    %313 = arith.truncf %303 : vector<32x4xf32> to vector<32x4xbf16>
    %cst_131 = arith.constant dense<0.000000e+00> : vector<1x32xf32>
    %314 = tpu.matmul %304, %313, %cst_131 {dimension_numbers = #tpu.dot_dimension_numbers<[1], [1], [0], [0], [0, 0, 1, 0], [], []>} : vector<1x4xbf16>, vector<32x4xbf16>, vector<1x32xf32> -> vector<1x32xf32>
    %315 = vector.broadcast %305 : vector<1x1xf32> to vector<1x32xf32>
    %316 = arith.addf %314, %315 : vector<1x32xf32>
    %c1_132 = arith.constant 1 : index
    %c0_133 = arith.constant 0 : index
    %c0_134 = arith.constant 0 : index
    %317 = vector.load %arg24[%c1_132, %c0_133, %c0_134] : memref<2x1x32xf32, #tpu.memory_space<vmem>>, vector<1x1x32xf32>
    %318 = vector.shape_cast %317 : vector<1x1x32xf32> to vector<1x32xf32>
    %319 = vector.shape_cast %316 : vector<1x32xf32> to vector<1x1x32xf32>
    tpu.vector_store %arg24[%c1_132, %c0_133, %c0_134], %319 {strides = array<i32>} : memref<2x1x32xf32, #tpu.memory_space<vmem>>, vector<1x1x32xf32>,
    return
  }
  func.func @transform_0(%arg0: i32) -> (i32, i32, i32) {
    %c0_i32 = arith.constant 0 : i32
    %c0_i32_0 = arith.constant 0 : i32
    %c0_i32_1 = arith.constant 0 : i32
    %c0_i32_2 = arith.constant 0 : i32
    return %c0_i32, %c0_i32_0, %c0_i32_1 : i32, i32, i32
  }
  func.func @transform_1(%arg0: i32) -> (i32, i32, i32) {
    %c0_i32 = arith.constant 0 : i32
    %c0_i32_0 = arith.constant 0 : i32
    %c0_i32_1 = arith.constant 0 : i32
    %c0_i32_2 = arith.constant 0 : i32
    return %c0_i32, %c0_i32_0, %c0_i32_1 : i32, i32, i32
  }
  func.func @transform_2(%arg0: i32) -> (i32, i32) {
    %c0_i32 = arith.constant 0 : i32
    %c0_i32_0 = arith.constant 0 : i32
    %c0_i32_1 = arith.constant 0 : i32
    return %c0_i32, %c0_i32_0 : i32, i32
  }
  func.func @transform_3(%arg0: i32) -> (i32, i32) {
    %c0_i32 = arith.constant 0 : i32
    %c0_i32_0 = arith.constant 0 : i32
    %c0_i32_1 = arith.constant 0 : i32
    return %c0_i32, %c0_i32_0 : i32, i32
  }
  func.func @transform_4(%arg0: i32) -> (i32, i32) {
    %c0_i32 = arith.constant 0 : i32
    %c0_i32_0 = arith.constant 0 : i32
    %c0_i32_1 = arith.constant 0 : i32
    return %c0_i32, %c0_i32_0 : i32, i32
  }
  func.func @transform_5(%arg0: i32) -> (i32, i32) {
    %c0_i32 = arith.constant 0 : i32
    %c0_i32_0 = arith.constant 0 : i32
    %c0_i32_1 = arith.constant 0 : i32
    return %c0_i32, %c0_i32_0 : i32, i32
  }
  func.func @transform_6(%arg0: i32) -> (i32, i32) {
    %c0_i32 = arith.constant 0 : i32
    %c0_i32_0 = arith.constant 0 : i32
    %c0_i32_1 = arith.constant 0 : i32
    return %c0_i32, %c0_i32_0 : i32, i32
  }
  func.func @transform_7(%arg0: i32) -> (i32, i32) {
    %c0_i32 = arith.constant 0 : i32
    %c0_i32_0 = arith.constant 0 : i32
    %c0_i32_1 = arith.constant 0 : i32
    return %c0_i32, %c0_i32_0 : i32, i32
  }
  func.func @transform_8(%arg0: i32) -> (i32, i32) {
    %c0_i32 = arith.constant 0 : i32
    %c0_i32_0 = arith.constant 0 : i32
    %c0_i32_1 = arith.constant 0 : i32
    return %c0_i32, %c0_i32_0 : i32, i32
  }
  func.func @transform_9(%arg0: i32) -> (i32, i32) {
    %c0_i32 = arith.constant 0 : i32
    %c0_i32_0 = arith.constant 0 : i32
    %c0_i32_1 = arith.constant 0 : i32
    return %c0_i32, %c0_i32_0 : i32, i32
  }
  func.func @transform_10(%arg0: i32) -> (i32, i32) {
    %c0_i32 = arith.constant 0 : i32
    %c0_i32_0 = arith.constant 0 : i32
    %c0_i32_1 = arith.constant 0 : i32
    return %c0_i32, %c0_i32_0 : i32, i32
  }
  func.func @transform_11(%arg0: i32) -> (i32, i32, i32) {
    %c0_i32 = arith.constant 0 : i32
    %c0_i32_0 = arith.constant 0 : i32
    %c0_i32_1 = arith.constant 0 : i32
    %c0_i32_2 = arith.constant 0 : i32
    return %c0_i32, %c0_i32_0, %c0_i32_1 : i32, i32, i32
  }
  func.func @transform_12(%arg0: i32) -> (i32, i32) {
    %c0_i32 = arith.constant 0 : i32
    %c0_i32_0 = arith.constant 0 : i32
    %c0_i32_1 = arith.constant 0 : i32
    return %c0_i32, %c0_i32_0 : i32, i32
  }
  func.func @transform_13(%arg0: i32) -> (i32, i32) {
    %c0_i32 = arith.constant 0 : i32
    %c0_i32_0 = arith.constant 0 : i32
    %c0_i32_1 = arith.constant 0 : i32
    return %c0_i32, %c0_i32_0 : i32, i32
  }
  func.func @transform_14(%arg0: i32) -> (i32, i32) {
    %c0_i32 = arith.constant 0 : i32
    %c0_i32_0 = arith.constant 0 : i32
    %c0_i32_1 = arith.constant 0 : i32
    return %c0_i32, %c0_i32_0 : i32, i32
  }
  func.func @transform_15(%arg0: i32) -> (i32, i32) {
    %c0_i32 = arith.constant 0 : i32
    %c0_i32_0 = arith.constant 0 : i32
    %c0_i32_1 = arith.constant 0 : i32
    return %c0_i32, %c0_i32_0 : i32, i32
  }
  func.func @transform_16(%arg0: i32) -> (i32, i32) {
    %c0_i32 = arith.constant 0 : i32
    %c0_i32_0 = arith.constant 0 : i32
    %c0_i32_1 = arith.constant 0 : i32
    return %c0_i32, %c0_i32_0 : i32, i32
  }
  func.func @transform_17(%arg0: i32) -> (i32, i32) {
    %c0_i32 = arith.constant 0 : i32
    %c0_i32_0 = arith.constant 0 : i32
    %c0_i32_1 = arith.constant 0 : i32
    return %c0_i32, %c0_i32_0 : i32, i32
  }
  func.func @transform_18(%arg0: i32) -> (i32, i32) {
    %c0_i32 = arith.constant 0 : i32
    %c0_i32_0 = arith.constant 0 : i32
    %c0_i32_1 = arith.constant 0 : i32
    return %c0_i32, %c0_i32_0 : i32, i32
  }
  func.func @transform_19(%arg0: i32) -> (i32, i32) {
    %c0_i32 = arith.constant 0 : i32
    %c0_i32_0 = arith.constant 0 : i32
    %c0_i32_1 = arith.constant 0 : i32
    return %c0_i32, %c0_i32_0 : i32, i32
  }
  func.func @transform_20(%arg0: i32) -> (i32, i32) {
    %c0_i32 = arith.constant 0 : i32
    %c0_i32_0 = arith.constant 0 : i32
    %c0_i32_1 = arith.constant 0 : i32
    return %c0_i32, %c0_i32_0 : i32, i32
  }
  func.func @transform_21(%arg0: i32) -> (i32, i32) {
    %c0_i32 = arith.constant 0 : i32
    %c0_i32_0 = arith.constant 0 : i32
    %c0_i32_1 = arith.constant 0 : i32
    return %c0_i32, %c0_i32_0 : i32, i32
  }
  func.func @transform_22(%arg0: i32) -> (i32, i32) {
    %c0_i32 = arith.constant 0 : i32
    %c0_i32_0 = arith.constant 0 : i32
    %c0_i32_1 = arith.constant 0 : i32
    return %c0_i32, %c0_i32_0 : i32, i32
  }
  func.func @transform_23(%arg0: i32) -> (i32, i32, i32) {
    %c0_i32 = arith.constant 0 : i32
    %c0_i32_0 = arith.constant 0 : i32
    %c0_i32_1 = arith.constant 0 : i32
    %c0_i32_2 = arith.constant 0 : i32
    return %c0_i32, %c0_i32_0, %c0_i32_1 : i32, i32, i32
  }
}

</mosaic_0001>

<bundles_post_ra>
// kernel: decoder_forward.1
= control target key start
LH: loop header
LB: loop body
LE: loop exit
PB: predicated region body
PF: predicated region fallthrough
CT: control target
= control target key end

     0   :  { %s3457_s0 = inlined_call_operand.vmem [shape: f32[2,16,8], index: 0, kind: input, shape index: {}]   ;;  %s3458_s1 = inlined_call_operand.vmem [shape: f32[2,8,16], index: 1, kind: input, shape index: {}]   ;;  %s3459_s2 = inlined_call_operand.vmem [shape: bf16[16,16], index: 2, kind: input, shape index: {}]   ;;  %s3460_s3 = inlined_call_operand.vmem [shape: f32[1,8], index: 3, kind: input, shape index: {}]   ;;  %s3461_s4 = inlined_call_operand.vmem [shape: f32[16,16], index: 4, kind: input, shape index: {}]   ;;  %s3462_s5 = inlined_call_operand.vmem [shape: bf16[48,8], index: 5, kind: input, shape index: {}]   ;;  %s3463_s6 = inlined_call_operand.vmem [shape: f32[1,8], index: 6, kind: input, shape index: {}]   ;;  %s3464_s7 = inlined_call_operand.vmem [shape: f32[1,8], index: 7, kind: input, shape index: {}]   ;;  %s3465_s8 = inlined_call_operand.vmem [shape: bf16[24,8], index: 8, kind: input, shape index: {}]   ;;  %s3466_s9 = inlined_call_operand.vmem [shape: f32[1,8], index: 9, kind: input, shape index: {}]   ;;  %s3467_s10 = inlined_call_operand.vmem [shape: f32[1,8], index: 10, kind: input, shape index: {}]   ;;  %s3468_s11 = inlined_call_operand.vmem [shape: f32[2,4,32], index: 11, kind: input, shape index: {}]   ;;  %s3469_s12 = inlined_call_operand.vmem [shape: bf16[8,8], index: 12, kind: input, shape index: {}]   ;;  %s3470_s13 = inlined_call_operand.vmem [shape: f32[1,4], index: 13, kind: input, shape index: {}]   ;;  %s3471_s14 = inlined_call_operand.vmem [shape: f32[32,32], index: 14, kind: input, shape index: {}]   ;;  %s3472_s15 = inlined_call_operand.vmem [shape: bf16[24,4], index: 15, kind: input, shape index: {}]   ;;  %s3473_s16 = inlined_call_operand.vmem [shape: f32[1,4], index: 16, kind: input, shape index: {}]   ;;  %s3474_s17 = inlined_call_operand.vmem [shape: f32[1,4], index: 17, kind: input, shape index: {}]   ;;  %s3475_s18 = inlined_call_operand.vmem [shape: bf16[12,4], index: 18, kind: input, shape index: {}]   ;;  %s3476_s19 = inlined_call_operand.vmem [shape: f32[1,4], index: 19, kind: input, shape index: {}]   ;;  %s3477_s20 = inlined_call_operand.vmem [shape: f32[1,4], index: 20, kind: input, shape index: {}]   ;;  %s3478_s21 = inlined_call_operand.vmem [shape: bf16[1,4], index: 21, kind: input, shape index: {}]   ;;  %s3479_s22 = inlined_call_operand.<no memory space> [shape: f32[1,1], index: 22, kind: input, shape index: {}]   ;;  %s3480_s23 = inlined_call_operand.hbm [shape: f32[2,1,32], index: 23, kind: output, shape index: {}]  }
   0x1   :  { %3485 = sst [smem:[#allocation6_spill]] %s3457_s0  ;;  %v28_v0 = vstv %s3479_s22 }
   0x2   :  { %3486 = sst [smem:[#allocation7_spill]] %s3458_s1  ;;  %29 = vst [vmem:[#allocation2] sm:$0x1] %v28_v0 }
   0x3   :  { %3487 = sst [smem:[#allocation8_spill]] %s3459_s2 }
   0x4   :  { %3488 = sst [smem:[#allocation9_spill]] %s3460_s3 }
   0x5   :  { %3489 = sst [smem:[#allocation10_spill]] %s3461_s4 }
   0x6   :  { %3490 = sst [smem:[#allocation11_spill]] %s3462_s5 }
   0x7   :  { %3491 = sst [smem:[#allocation12_spill]] %s3463_s6 }
   0x8   :  { %3492 = sst [smem:[#allocation13_spill]] %s3464_s7 }
   0x9   :  { %s3493_s5 = sld [smem:[#allocation6_spill]]  ;;  %v2762_v2 = vmov 0.0   ;;  %s3494_s2 = sld [smem:[#allocation8_spill]]  ;;  %vm2763_vm0 = vmmov 0  }
   0xa   :  { %2375 = vmatprep.subr.bf16.mxu0 %v2762_v2  ;;  %2377 = vmatprep.mubr.msk.bf16.mxu0 %vm2763_vm0, %v2762_v2 }
   0xf   :  { %v78_v1 = vld [vmem:[%s3493_s5] sm:$0xff]  ;;  %v79_v4 = vld [vmem:[%s3493_s5 + $0x8] sm:$0xff] }
  0x10   :  { %80 = vxpose.xlu0.b32.start [1/2] (short) (narrow) %v78_v1, 8  ;;  %v2721_v3 = vld [vmem:[%s3494_s2] sm:$0xff]  }
  0x11   :  { %2376 = vmatpush3.bf16.msra.mxu0 %v2721_v3 }
  0x12   :  { %2388 = vmatprep.subr.bf16.mxu0 %v2762_v2 }
  0x14   :  { %81 = vxpose.xlu0.b32.end [2/2] (short) (narrow) %v79_v4, 8 }
  0x15   :  { %30 = vsyncpa [#allocation4], 0  ;;  %vm168_vm1 = vcmask 130048   ;;  %s3495_s28 = sld [smem:[#allocation10_spill]]  ;;  %s2764_s29 = smov 120   ;;  %v2264_v12 = vld [vmem:[%s3493_s5 + $0x10] sm:$0xff] }
  0x16   :  { %v2265_v13 = vld [vmem:[%s3493_s5 + $0x18] sm:$0xff]  ;;  %s3496_s26 = sld [smem:[#allocation7_spill]]  ;;  %s2765_s27 = smov 8   ;;  %vm344_vm2 = vcmask 64512   ;;  %vm356_vm3 = vcmask 1046528   ;;  %vm349_vm4 = vcmask 1040384  }
  0x17   :  { %s3498_s30 = sld [smem:[#allocation9_spill]]  ;;  %s2766_s5 = smov 16   ;;  %vm377_vm5 = vcmask 261120   ;;  %vm399_vm6 = vcmask 392192   ;;  %vm805_vm7 = vcmask 1043456   ;;  %vm801_vm8 = vcmask 195584  }
  0x18   :  { %s2767_s1 = smov 32   ;;  %s3499_s6 = sld [smem:[#allocation12_spill]]  ;;  %vm1230_vm9 = vcmask 31744   ;;  %vm1842_vm10 = vcmask 1045504   ;;  %vm1835_vm11 = vcmask 97280   ;;  %vm2196_vm12 = vcmask 253952  }
  0x19   :  { %s2769_s4 = smov 4  }
  0x1b   :  { %v150_v7 = vld [vmem:[%s3495_s28] sm:$0xff]  ;;  %v151_v16 = vld [vmem:[%s3495_s28 + $0x8] sm:$0xff]  ;;  %s3497_s28 = sld [smem:[#allocation11_spill]] }
  0x1c   :  { %2385 = vmatprep.mubr.msk.f32.mxu1 %vm168_vm1, %v150_v7  ;;  %v2278_v19 = vld [vmem:[%s3496_s26 + $0x8] sm:$0xff]  ;;  %v303_v26 = vld [vmem:[%s3496_s26] sm:$0xff]  ;;  %s2768_s26 = smov 124  }
  0x1d   :  { %v2268_v37 = vld [vmem:[%s3498_s30] ss:$0 sm:$0xff] }
  0x21   :  { %v2946_v35 = vld [vmem:[%s3497_s28] sm:$0xff]   ;;  %v2953_v36 = vld [vmem:[%s3497_s28 + $0x8] sm:$0xff]   ;;  %v2963_v38 = vld [vmem:[%s3497_s28 + $0x10] sm:$0xff]   ;;  %s3500_s28 = sld [smem:[#allocation13_spill]] }
  0x90   :  { %v96_v5 = vpop.trf.xlu0 }
  0x91   :  { %v161_v6 = vpack.c.bf16 %v96_v5, %v96_v5 }
  0x93   :  { %2378 = vmatmul.mubr.msk.bf16.vlgmr.msra.gmra.mrb[0].mxu0 %vm168_vm1, %v161_v6 }
  0x94   :  { %2394 = vmatprep.mubr.msk.bf16.mxu0 %vm2763_vm0, %v2762_v2  ;;  %2389 = vmatpush3.bf16.msra.mxu0 %v2946_v35 }
  0x95   :  { %2390 = vmatprep.subr.bf16.mxu0 %v2762_v2 }
  0x98   :  { %2391 = vmatpush3.bf16.msra.mxu0 %v2953_v36 }
  0x99   :  { %2392 = vmatprep.subr.bf16.mxu0 %v2762_v2 }
  0x9c   :  { %2393 = vmatpush3.bf16.msra.mxu0 %v2963_v38 }
  0x9d   :  { %2411 = vmatprep.subr.bf16.mxu0 %v2762_v2 }
 0x166   :  { %v206_v8 = vpop.f32.mrb[0].mxu0 }
 0x167   :  { %213 = vrot.lane.b32.xlu1 %v206_v8, %s2764_s29  ;;  %v2379_v9 = vpop.f32.mrb[1].mxu0 }
 0x168   :  { %v209_v10 = vpop.f32.mrb[2].mxu0 }
 0x169   :  { %v2380_v11 = vpop.f32.mrb[3].mxu0 }
 0x190   :  { %115 = vxpose.xlu1.b32.start [1/2] (short) (narrow) %v2264_v12, 8 }
 0x194   :  { %116 = vxpose.xlu1.b32.end [2/2] (short) (narrow) %v2265_v13, 8 }
 0x198   :  { %591 = vxpose.xlu1.b32.start.end [1/1] (short) (narrow) %v2278_v19, 16 }
 0x1d9   :  { %v214_v14 = vpop.permute.xlu1 %213 }
 0x1da   :  { %v2521_v15 = vpack.c.bf16 %v214_v14, %v206_v8 }
 0x1dc   :  { %2522 = vmatprep.subr.bf16.mxu1 %v2521_v15 }
 0x1dd   :  { %2524 = vmatpush3.bf16.msra.mxu1 %v2521_v15 }
 0x1de   :  { %2398 = vmatprep.subr.bf16.mxu1 %v2762_v2 }
 0x1e0   :  { %2386 = vmatmul.mubr.msk.f32.vlgmr.msra.gmra.mrb[0].mxu1 %vm168_vm1, %v151_v16 }
 0x1e1   :  { %2399 = vmatpush3.bf16.msra.mxu1 %v2721_v3  ;;  %2400 = vmatprep.mubr.msk.bf16.mxu1 %vm2763_vm0, %v2762_v2 }
 0x210   :  { %v131_v17 = vpop.trf.xlu1 }
 0x211   :  { %v466_v18 = vpack.c.bf16 %v131_v17, %v131_v17 }
 0x213   :  { %2401 = vmatmul.mubr.msk.bf16.vlgmr.msra.gmra.mrb[4].mxu1 %vm168_vm1, %v466_v18 }
 0x214   :  { %2408 = vmatprep.mubr.msk.f32.mxu1 %vm168_vm1, %v150_v7 }
 0x218   :  { %v607_v27 = vpop.trf.xlu1 }
 0x21c   :  { %v608_v28 = vpop.trf.xlu1 }
 0x21d   :  { %v2565_v29 = vpack.i.bf16 %v608_v28, %v607_v27 }
 0x2b3   :  { %v2387_v20 = vpop.f32.mrb[0].mxu1 }
 0x2b4   :  { %v294_v21 = vpop.f32.mrb[1].mxu1  ;;  %v300_v40 = vadd.f32 %v2387_v20, %v2268_v37 }
 0x2b5   :  { %v295_v41 = vadd.f32 %v2268_v37, %v294_v21 }
 0x2e6   :  { %v504_v22 = vpop.f32.mrb[4].mxu1 }
 0x2e7   :  { %511 = vrot.lane.b32.xlu0 %v504_v22, %s2764_s29  ;;  %v2402_v23 = vpop.f32.mrb[5].mxu1 }
 0x2e8   :  { %v507_v24 = vpop.f32.mrb[6].mxu1 }
 0x2e9   :  { %v2403_v25 = vpop.f32.mrb[7].mxu1 }
 0x305   :  { %304 = vxpose.xlu0.b32.start.end [1/1] (short) (narrow) %v303_v26, 16 }
 0x332   :  { %2566 = vrot.lane.b32.xlu0 %v2565_v29, %s2765_s27 }
 0x359   :  { %v512_v30 = vpop.permute.xlu0 %511 }
 0x35a   :  { %v2525_v31 = vpack.c.bf16 %v512_v30, %v504_v22 }
 0x35c   :  { %2526 = vmatprep.subr.bf16.mxu1 %v2525_v31 }
 0x35d   :  { %2528 = vmatpush3.bf16.msra.mxu1 %v2525_v31 }
 0x35e   :  { %2421 = vmatprep.subr.bf16.mxu1 %v2762_v2 }
 0x360   :  { %2409 = vmatmul.mubr.msk.f32.vlgmr.msra.gmra.mrb[2].mxu1 %vm168_vm1, %v151_v16 }
 0x361   :  { %2425 = vmatprep.mubr.msk.bf16.mxu1 %vm2763_vm0, %v2762_v2 }
 0x385   :  { %v320_v32 = vpop.trf.xlu0 }
 0x389   :  { %v321_v33 = vpop.trf.xlu0 }
 0x38a   :  { %v2560_v34 = vpack.i.bf16 %v321_v33, %v320_v32 }
 0x38c   :  { %2561 = vrot.lane.b32.xlu1 %v2560_v34, %s2765_s27 }
 0x3a4   :  { %v2567_v55 = vpop.permute.xlu0 %2566 }
 0x3a5   :  { %v2569_v59 = vunpack.i.h.bf16 %v2567_v55  ;;  %v2568_v61 = vunpack.i.l.bf16 %v2567_v55 }
 0x3fe   :  { %v2562_v39 = vpop.permute.xlu1 %2561 }
 0x3ff   :  { %v2564_v42 = vunpack.i.h.bf16 %v2562_v39  ;;  %v2563_v43 = vunpack.i.l.bf16 %v2562_v39 }
 0x401   :  { %v345_v44 = vsel %vm344_vm2, %v295_v41, %v2563_v43  ;;  %v346_v45 = vsel %vm344_vm2, %v300_v40, %v2564_v42 }
 0x402   :  { %v351_v46 = vrot.slane %v346_v45, 7  ;;  %v2570_v47 = vpack.i.bf16 %v346_v45, %v345_v44  ;;  %v350_v48 = vrot.slane %v345_v44, 7  ;;  %v357_v49 = vrot.slane %v345_v44, 1 }
 0x403   :  { %v358_v50 = vrot.slane %v346_v45, 1 }
 0x404   :  { %2571 = vrot.lane.b32.xlu1 %v2570_v47, %s2766_s5  ;;  %v352_v51 = vsel %vm349_vm4, %v350_v48, %v351_v46  ;;  %v355_v14 = vsel %vm349_vm4, 0.0, %v350_v48 }
 0x405   :  { %v359_v52 = vsel %vm356_vm3, %v357_v49, %v358_v50  ;;  %v361_v53 = vsel %vm356_vm3, %v358_v50, 0.0 }
 0x406   :  { %v2575_v54 = vpack.i.bf16 %v361_v53, %v359_v52 }
 0x408   :  { %2576 = vrot.lane.b32.xlu1 %v2575_v54, %s2767_s1 }
 0x433   :  { %v2410_v56 = vpop.f32.mrb[2].mxu1 }
 0x434   :  { %v586_v57 = vadd.f32 %v2410_v56, %v2268_v37  ;;  %v580_v58 = vpop.f32.mrb[3].mxu1 }
 0x435   :  { %v581_v60 = vadd.f32 %v2268_v37, %v580_v58 }
 0x436   :  { %v632_v62 = vsel %vm344_vm2, %v586_v57, %v2569_v59 }
 0x437   :  { %v631_v63 = vsel %vm344_vm2, %v581_v60, %v2568_v61  ;;  %v636_v0 = vrot.slane %v632_v62, 7  ;;  %v642_v1 = vrot.slane %v632_v62, 1 }
 0x438   :  { %v2580_v3 = vpack.i.bf16 %v632_v62, %v631_v63  ;;  %v635_v4 = vrot.slane %v631_v63, 7  ;;  %v641_v5 = vrot.slane %v631_v63, 1 }
 0x439   :  { %v645_v6 = vsel %vm356_vm3, %v642_v1, 0.0 }
 0x43a   :  { %2581 = vrot.lane.b32.xlu1 %v2580_v3, %s2766_s5  ;;  %v643_v7 = vsel %vm356_vm3, %v641_v5, %v642_v1  ;;  %v637_v8 = vsel %vm349_vm4, %v635_v4, %v636_v0  ;;  %v640_v26 = vsel %vm349_vm4, 0.0, %v635_v4 }
 0x43b   :  { %v2585_v9 = vpack.i.bf16 %v645_v6, %v643_v7 }
 0x43e   :  { %2586 = vrot.lane.b32.xlu1 %v2585_v9, %s2767_s1 }
 0x476   :  { %v2572_v10 = vpop.permute.xlu1 %2571 }
 0x477   :  { %v2574_v11 = vunpack.i.h.bf16 %v2572_v10  ;;  %v2573_v12 = vunpack.i.l.bf16 %v2572_v10 }
 0x479   :  { %v375_v17 = vsel %vm168_vm1, %v355_v14, %v2573_v12  ;;  %v376_v18 = vsel %vm168_vm1, %v352_v51, %v2574_v11 }
 0x47a   :  { %v2577_v13 = vpop.permute.xlu1 %2576 }
 0x47b   :  { %v2579_v15 = vunpack.i.h.bf16 %v2577_v13  ;;  %v2578_v16 = vunpack.i.l.bf16 %v2577_v13 }
 0x47d   :  { %v378_v19 = vsel %vm377_vm5, %v375_v17, %v2578_v16  ;;  %v379_v20 = vsel %vm377_vm5, %v376_v18, %v2579_v15 }
 0x47e   :  { %v380_v21 = vpack.c.bf16 %v379_v20, %v378_v19 }
 0x480   :  { %2395 = vmatmul.mubr.msk.bf16.vlgmr.msra.gmra.mrb[4].mxu0 %vm399_vm6, %v380_v21 }
 0x481   :  { %2412 = vmatpush3.bf16.msra.mxu0 %v2946_v35  ;;  %2417 = vmatprep.mubr.msk.bf16.mxu0 %vm2763_vm0, %v2762_v2 }
 0x482   :  { %2413 = vmatprep.subr.bf16.mxu0 %v2762_v2 }
 0x485   :  { %2414 = vmatpush3.bf16.msra.mxu0 %v2953_v36 }
 0x486   :  { %2415 = vmatprep.subr.bf16.mxu0 %v2762_v2 }
 0x489   :  { %2416 = vmatpush3.bf16.msra.mxu0 %v2963_v38 }
 0x48a   :  { %2437 = vmatprep.subr.bf16.mxu0 %v2762_v2 }
 0x4ac   :  { %v2582_v22 = vpop.permute.xlu1 %2581 }
 0x4ad   :  { %v2584_v23 = vunpack.i.h.bf16 %v2582_v22  ;;  %v2583_v24 = vunpack.i.l.bf16 %v2582_v22 }
 0x4af   :  { %v660_v29 = vsel %vm168_vm1, %v637_v8, %v2584_v23  ;;  %v659_v30 = vsel %vm168_vm1, %v640_v26, %v2583_v24 }
 0x4b0   :  { %v2587_v25 = vpop.permute.xlu1 %2586 }
 0x4b1   :  { %v2589_v27 = vunpack.i.h.bf16 %v2587_v25  ;;  %v2588_v28 = vunpack.i.l.bf16 %v2587_v25 }
 0x4b3   :  { %v661_v31 = vsel %vm377_vm5, %v659_v30, %v2588_v28  ;;  %v662_v32 = vsel %vm377_vm5, %v660_v29, %v2589_v27  ;;  %v744_v27 = vlaneseq  ;;  %v730_v29 = vld [vmem:[%s3499_s6] sm:$0x1]  ;;  %s2771_s6 = smov [#allocation3]  }
 0x4b4   :  { %v663_v33 = vpack.c.bf16 %v662_v32, %v661_v31  ;;  %s2253_s22 = sshll.u32 %s2771_s6, 4  ;;  %s2254_s22 = int_to_ptr.vmem [resolvable:$true] %s2253_s22 }
 0x4b5   :  { %v745_v28 = vshrl.u32 %v744_v27, 7  ;;  %p2743_p1 = scmp.lt.s32.totalorder %s2254_s22, %s2254_s22 }
 0x4b6   :  { %2418 = vmatmul.mubr.msk.bf16.vlgmr.msra.gmra.mrb[8].mxu0 %vm399_vm6, %v663_v33  ;;  %v731_v33 = vld [vmem:[%s3500_s28] sm:$0x1] }
 0x4b7   :  { %2439 = vmatprep.mubr.msk.bf16.mxu0 %vm2763_vm0, %v2762_v2  ;;  %v3022_v30 = vsub.s32 0, %v745_v28 }
 0x553   :  { %v3001_v34 = vpop.f32.mrb[4].mxu0 }
 0x554   :  { %v454_v35 = vmul.f32 %v3001_v34, %v3001_v34  ;;  %v2396_v36 = vpop.f32.mrb[5].mxu0  ;;  %v444_v38 = vsel %vm344_vm2, %v3001_v34, 0.0 }
 0x555   :  { %v3005_v37 = vpop.f32.mrb[6].mxu0 }
 0x556   :  { %v445_v39 = vsel %vm344_vm2, %v3005_v37, 0.0  ;;  %v455_v40 = vmul.f32 %v3005_v37, %v3005_v37  ;;  %v2397_v41 = vpop.f32.mrb[7].mxu0  ;;  %v456_v43 = vsel %vm344_vm2, %v454_v35, 0.0 }
 0x557   :  { %v446_v42 = vadd.f32 %v445_v39, %v444_v38  ;;  %v2725_v38 = vld [vmem:[%s3465_s8] sm:$0xff]  }
 0x558   :  { %v457_v44 = vsel %vm344_vm2, %v455_v40, 0.0  ;;  %2422 = vmatpush3.bf16.msra.mxu1 %v2725_v38 }
 0x559   :  { %v458_v45 = vadd.f32 %v457_v44, %v456_v43  ;;  %v447_v46 = vrot.slane %v446_v42, 4  ;;  %2423 = vmatprep.subr.bf16.mxu1 %v2762_v2 }
 0x55b   :  { %v459_v47 = vrot.slane %v458_v45, 4  ;;  %v448_v48 = vadd.f32 %v447_v46, %v446_v42 }
 0x55d   :  { %v460_v52 = vadd.f32 %v459_v47, %v458_v45  ;;  %v449_v58 = vrot.slane %v448_v48, 2  ;;  %v2726_v45 = vld [vmem:[%s3465_s8 + $0x8] ss:$0 sps:$4 sm:$0xff]  }
 0x55f   :  { %v461_v62 = vrot.slane %v460_v52, 2  ;;  %v450_v1 = vadd.f32 %v449_v58, %v448_v48 }
 0x561   :  { %v462_v5 = vadd.f32 %v461_v62, %v460_v52  ;;  %v451_v8 = vrot.slane %v450_v1, 1 }
 0x563   :  { %v463_v11 = vrot.slane %v462_v5, 1  ;;  %v452_v14 = vadd.f32 %v451_v8, %v450_v1 }
 0x565   :  { %v464_v17 = vadd.f32 %v463_v11, %v462_v5 }
 0x589   :  { %v701_v49 = vpop.f32.mrb[8].mxu0 }
 0x58a   :  { %v718_v50 = vmul.f32 %v701_v49, %v701_v49  ;;  %v2419_v51 = vpop.f32.mrb[9].mxu0  ;;  %v708_v54 = vsel %vm344_vm2, %v701_v49, 0.0 }
 0x58b   :  { %v704_v53 = vpop.f32.mrb[10].mxu0  ;;  %v807_v51 = vsel %vm805_vm7, %v2726_v45, 0 }
 0x58c   :  { %v709_v55 = vsel %vm344_vm2, %v704_v53, 0.0  ;;  %v719_v56 = vmul.f32 %v704_v53, %v704_v53  ;;  %v2420_v57 = vpop.f32.mrb[11].mxu0  ;;  %v720_v60 = vsel %vm344_vm2, %v718_v50, 0.0  ;;  %2424 = vmatpush3.bf16.msra.mxu1 %v807_v51 }
 0x58d   :  { %v710_v59 = vadd.f32 %v709_v55, %v708_v54  ;;  %2429 = vmatprep.subr.bf16.mxu1 %v2762_v2 }
 0x58e   :  { %v721_v61 = vsel %vm344_vm2, %v719_v56, 0.0 }
 0x58f   :  { %v711_v63 = vrot.slane %v710_v59, 4  ;;  %v722_v0 = vadd.f32 %v721_v61, %v720_v60 }
 0x591   :  { %v712_v3 = vadd.f32 %v711_v63, %v710_v59  ;;  %v723_v4 = vrot.slane %v722_v0, 4 }
 0x593   :  { %v713_v6 = vrot.slane %v712_v3, 2  ;;  %v724_v7 = vadd.f32 %v723_v4, %v722_v0 }
 0x595   :  { %v714_v9 = vadd.f32 %v713_v6, %v712_v3  ;;  %v725_v10 = vrot.slane %v724_v7, 2 }
 0x597   :  { %v715_v12 = vrot.slane %v714_v9, 1  ;;  %v726_v13 = vadd.f32 %v725_v10, %v724_v7 }
 0x599   :  { %v716_v15 = vadd.f32 %v715_v12, %v714_v9  ;;  %v727_v16 = vrot.slane %v726_v13, 1 }
 0x59b   :  { %v717_v18 = vadd.f32 %v716_v15, %v452_v14  ;;  %v728_v19 = vadd.f32 %v727_v16, %v726_v13 }
 0x59d   :  { %v729_v20 = vadd.f32 %v728_v19, %v464_v17  ;;  %v733_v21 = vmul.f32 0.03125, %v717_v18 }
 0x59f   :  { %v734_v22 = vmul.f32 0.03125, %v729_v20  ;;  %v735_v23 = vmul.f32 %v733_v21, %v733_v21 }
 0x5a1   :  { %v736_v24 = vsub.f32 %v734_v22, %v735_v23 }
 0x5a3   :  { %v737_v25 = vmax.f32 %v736_v24, 0.0 }
 0x5a5   :  { %v738_v26 = vadd.f32 1e-05, %v737_v25 }
 0x5a7   :  { %2730 = vrsqrt.f32 %v738_v26 }
 0x5b1   :  { %v2731_v31 = vpop.eup %2730 }
 0x5b2   :  { %v740_v32 = vmul.f32 %v2731_v31, %v730_v29 }
 0x5b4   :  { %v741_v35 = vmul.f32 %v740_v32, %v733_v21  ;;  %v747_v36 = vrot.slane %v740_v32, %v3022_v30 }
 0x5b6   :  { %v742_v39 = vsub.f32 %v731_v33, %v741_v35  ;;  %v873_v40 = vmul.f32 %v747_v36, %v704_v53  ;;  %v749_v41 = vmul.f32 %v747_v36, %v3001_v34  ;;  %v750_v42 = vmul.f32 %v747_v36, %v3005_v37  ;;  %v1011_v33 = vld [vmem:[%s3469_s12] sm:$0xf] }
 0x5b7   :  { %v872_v43 = vmul.f32 %v747_v36, %v701_v49  ;;  %v3069_v35 = vsel %vm805_vm7, %v1011_v33, 0 }
 0x5b8   :  { %v755_v44 = vrot.slane %v742_v39, %v3022_v30  ;;  %2438 = vmatpush3.bf16.msra.mxu0 %v3069_v35 }
 0x5ba   :  { %v875_v46 = vadd.f32 %v873_v40, %v755_v44  ;;  %v757_v47 = vadd.f32 %v755_v44, %v749_v41  ;;  %v758_v48 = vadd.f32 %v755_v44, %v750_v42  ;;  %v874_v50 = vadd.f32 %v872_v43, %v755_v44 }
 0x5bc   :  { %v877_v34 = vmax.f32 %v875_v46, 0.0  ;;  %v759_v52 = vmax.f32 %v757_v47, 0.0  ;;  %v760_v37 = vmax.f32 %v758_v48, 0.0  ;;  %v876_v49 = vmax.f32 %v874_v50, 0.0 }
 0x5be   :  { %v881_v53 = vrot.slane %v877_v34, 7  ;;  %v2590_v54 = vpack.i.bf16 %v760_v37, %v759_v52  ;;  %v769_v55 = vrot.slane %v759_v52, 1  ;;  %v770_v56 = vrot.slane %v760_v37, 1 }
 0x5bf   :  { %v2600_v57 = vpack.i.bf16 %v877_v34, %v876_v49  ;;  %v886_v58 = vrot.slane %v876_v49, 1  ;;  %v887_v59 = vrot.slane %v877_v34, 1  ;;  %v764_v60 = vrot.slane %v760_v37, 7 }
 0x5c0   :  { %2591 = vrot.lane.b32.xlu1 %v2590_v54, %s2765_s27  ;;  %v771_v61 = vsel %vm356_vm3, %v769_v55, %v770_v56  ;;  %v773_v62 = vsel %vm356_vm3, %v770_v56, 0.0  ;;  %v763_v63 = vrot.slane %v759_v52, 7  ;;  %v880_v0 = vrot.slane %v876_v49, 7 }
 0x5c1   :  { %v2595_v1 = vpack.i.bf16 %v773_v62, %v771_v61  ;;  %v888_v3 = vsel %vm356_vm3, %v886_v58, %v887_v59  ;;  %v890_v4 = vsel %vm356_vm3, %v887_v59, 0.0 }
 0x5c2   :  { %v2605_v5 = vpack.i.bf16 %v890_v4, %v888_v3  ;;  %v765_v6 = vsel %vm349_vm4, %v763_v63, %v764_v60  ;;  %v882_v7 = vsel %vm349_vm4, %v880_v0, %v881_v53  ;;  %v768_v12 = vsel %vm349_vm4, 0.0, %v763_v63 }
 0x5c3   :  { %v885_v24 = vsel %vm349_vm4, 0.0, %v880_v0 }
 0x5c4   :  { %2596 = vrot.lane.b32.xlu1 %v2595_v1, %s2766_s5 }
 0x5c8   :  { %2601 = vrot.lane.b32.xlu1 %v2600_v57, %s2765_s27 }
 0x5cc   :  { %2606 = vrot.lane.b32.xlu1 %v2605_v5, %s2766_s5 }
 0x632   :  { %v2592_v8 = vpop.permute.xlu1 %2591 }
 0x633   :  { %v2594_v9 = vunpack.i.h.bf16 %v2592_v8  ;;  %v2593_v10 = vunpack.i.l.bf16 %v2592_v8 }
 0x635   :  { %v787_v15 = vsel %vm344_vm2, %v768_v12, %v2593_v10  ;;  %v788_v16 = vsel %vm344_vm2, %v765_v6, %v2594_v9 }
 0x636   :  { %v2597_v11 = vpop.permute.xlu1 %2596 }
 0x637   :  { %v2599_v13 = vunpack.i.h.bf16 %v2597_v11  ;;  %v2598_v14 = vunpack.i.l.bf16 %v2597_v11 }
 0x639   :  { %v789_v17 = vsel %vm168_vm1, %v787_v15, %v2598_v14  ;;  %v790_v18 = vsel %vm168_vm1, %v788_v16, %v2599_v13 }
 0x63a   :  { %v791_v19 = vpack.c.bf16 %v790_v18, %v789_v17  ;;  %v2602_v20 = vpop.permute.xlu1 %2601 }
 0x63b   :  { %v2604_v21 = vunpack.i.h.bf16 %v2602_v20  ;;  %v2603_v22 = vunpack.i.l.bf16 %v2602_v20 }
 0x63c   :  { %2426 = vmatmul.mubr.msk.bf16.vlgmr.msra.gmra.mrb[8].mxu1 %vm801_vm8, %v791_v19 }
 0x63d   :  { %2430 = vmatpush3.bf16.msra.mxu1 %v2725_v38  ;;  %2433 = vmatprep.mubr.msk.bf16.mxu1 %vm2763_vm0, %v2762_v2  ;;  %v905_v27 = vsel %vm344_vm2, %v882_v7, %v2604_v21  ;;  %v904_v28 = vsel %vm344_vm2, %v885_v24, %v2603_v22 }
 0x63e   :  { %v2607_v23 = vpop.permute.xlu1 %2606  ;;  %2431 = vmatprep.subr.bf16.mxu1 %v2762_v2 }
 0x63f   :  { %v2609_v25 = vunpack.i.h.bf16 %v2607_v23  ;;  %v2608_v26 = vunpack.i.l.bf16 %v2607_v23 }
 0x641   :  { %v906_v29 = vsel %vm168_vm1, %v904_v28, %v2608_v26  ;;  %v907_v31 = vsel %vm168_vm1, %v905_v27, %v2609_v25  ;;  %2432 = vmatpush3.bf16.msra.mxu1 %v807_v51  ;;  %v975_v28 = vld [vmem:[%s3466_s9] sm:$0x1] }
 0x642   :  { %v908_v32 = vpack.c.bf16 %v907_v31, %v906_v29 }
 0x644   :  { %2434 = vmatmul.mubr.msk.bf16.vlgmr.msra.gmra.mrb[12].mxu1 %vm801_vm8, %v908_v32  ;;  %v976_v32 = vld [vmem:[%s3467_s10] sm:$0x1] }
 0x70f   :  { %v3072_v36 = vpop.f32.mrb[8].mxu1 }
 0x710   :  { %v860_v38 = vmul.f32 %v3072_v36, %v3072_v36  ;;  %v2427_v39 = vpop.f32.mrb[9].mxu1  ;;  %v850_v41 = vsel %vm344_vm2, %v3072_v36, 0.0 }
 0x711   :  { %v3076_v40 = vpop.f32.mrb[10].mxu1 }
 0x712   :  { %v851_v42 = vsel %vm344_vm2, %v3076_v40, 0.0  ;;  %v861_v43 = vmul.f32 %v3076_v40, %v3076_v40  ;;  %v2428_v44 = vpop.f32.mrb[11].mxu1  ;;  %v862_v46 = vsel %vm344_vm2, %v860_v38, 0.0 }
 0x713   :  { %v852_v45 = vadd.f32 %v851_v42, %v850_v41 }
 0x714   :  { %v863_v47 = vsel %vm344_vm2, %v861_v43, 0.0 }
 0x715   :  { %v853_v48 = vrot.slane %v852_v45, 4  ;;  %v864_v50 = vadd.f32 %v863_v47, %v862_v46 }
 0x717   :  { %v854_v51 = vadd.f32 %v853_v48, %v852_v45  ;;  %v865_v34 = vrot.slane %v864_v50, 4  ;;  %v946_v52 = vpop.f32.mrb[12].mxu1 }
 0x718   :  { %v963_v37 = vmul.f32 %v946_v52, %v946_v52  ;;  %v2435_v49 = vpop.f32.mrb[13].mxu1  ;;  %v953_v55 = vsel %vm344_vm2, %v946_v52, 0.0 }
 0x719   :  { %v866_v53 = vadd.f32 %v865_v34, %v864_v50  ;;  %v949_v54 = vpop.f32.mrb[14].mxu1  ;;  %v855_v59 = vrot.slane %v854_v51, 2 }
 0x71a   :  { %v954_v56 = vsel %vm344_vm2, %v949_v54, 0.0  ;;  %v964_v57 = vmul.f32 %v949_v54, %v949_v54  ;;  %v2436_v58 = vpop.f32.mrb[15].mxu1  ;;  %v965_v61 = vsel %vm344_vm2, %v963_v37, 0.0 }
 0x71b   :  { %v955_v60 = vadd.f32 %v954_v56, %v953_v55  ;;  %v867_v63 = vrot.slane %v866_v53, 2  ;;  %v856_v3 = vadd.f32 %v855_v59, %v854_v51  ;;  %v1181_v59 = vld [vmem:[%s3468_s11] sm:$0xf] }
 0x71c   :  { %v966_v62 = vsel %vm344_vm2, %v964_v57, 0.0 }
 0x71d   :  { %v956_v0 = vrot.slane %v955_v60, 4  ;;  %v967_v1 = vadd.f32 %v966_v62, %v965_v61  ;;  %v868_v6 = vadd.f32 %v867_v63, %v866_v53  ;;  %v857_v9 = vrot.slane %v856_v3, 1 }
 0x71f   :  { %v957_v4 = vadd.f32 %v956_v0, %v955_v60  ;;  %v968_v5 = vrot.slane %v967_v1, 4  ;;  %v869_v12 = vrot.slane %v868_v6, 1  ;;  %v858_v15 = vadd.f32 %v857_v9, %v856_v3  ;;  %v3115_v0 = vld [vmem:[%s3471_s14 + $0x8] sm:$0xff]  ;;  %v3130_v3 = vld [vmem:[%s3471_s14 + $0x18] sm:$0xff] }
 0x721   :  { %v958_v7 = vrot.slane %v957_v4, 2  ;;  %v969_v8 = vadd.f32 %v968_v5, %v967_v1  ;;  %v870_v18 = vadd.f32 %v869_v12, %v868_v6  ;;  %v3120_v1 = vld [vmem:[%s3471_s14 + $0x10] sm:$0xff] }
 0x723   :  { %v959_v10 = vadd.f32 %v958_v7, %v957_v4  ;;  %v970_v11 = vrot.slane %v969_v8, 2 }
 0x725   :  { %v960_v13 = vrot.slane %v959_v10, 1  ;;  %v971_v14 = vadd.f32 %v970_v11, %v969_v8 }
 0x727   :  { %v961_v16 = vadd.f32 %v960_v13, %v959_v10  ;;  %v972_v17 = vrot.slane %v971_v14, 1  ;;  %v2728_v10 = vld [vmem:[%s3472_s15 + $0x8] ss:$0 sps:$4 sm:$0xff]   ;;  %v3152_v13 = vld [vmem:[%s3470_s13] ss:$0 sm:$0xff] }
 0x728   :  { %v1311_v11 = vsel %vm805_vm7, %v2728_v10, 0 }
 0x729   :  { %v962_v19 = vadd.f32 %v961_v16, %v858_v15  ;;  %v973_v20 = vadd.f32 %v972_v17, %v971_v14 }
 0x72b   :  { %v974_v21 = vadd.f32 %v973_v20, %v870_v18  ;;  %v977_v22 = vmul.f32 0.03125, %v962_v19 }
 0x72d   :  { %v978_v23 = vmul.f32 0.03125, %v974_v21  ;;  %v979_v24 = vmul.f32 %v977_v22, %v977_v22 }
 0x72f   :  { %v980_v25 = vsub.f32 %v978_v23, %v979_v24 }
 0x731   :  { %v981_v26 = vmax.f32 %v980_v25, 0.0 }
 0x733   :  { %v982_v27 = vadd.f32 1e-05, %v981_v26 }
 0x735   :  { %2732 = vrsqrt.f32 %v982_v27 }
 0x73f   :  { %v2733_v29 = vpop.eup %2732 }
 0x740   :  { %v984_v31 = vmul.f32 %v2733_v29, %v975_v28 }
 0x742   :  { %v985_v33 = vmul.f32 %v984_v31, %v977_v22  ;;  %v991_v38 = vrot.slane %v984_v31, %v3022_v30 }
 0x744   :  { %v986_v39 = vsub.f32 %v976_v32, %v985_v33  ;;  %v1005_v41 = vmul.f32 %v991_v38, %v946_v52  ;;  %v1006_v42 = vmul.f32 %v991_v38, %v949_v54  ;;  %v993_v43 = vmul.f32 %v991_v38, %v3072_v36  ;;  %v3104_v36 = vld [vmem:[%s3471_s14] sm:$0xff] }
 0x745   :  { %v994_v44 = vmul.f32 %v991_v38, %v3076_v40  ;;  %2451 = vmatprep.mubr.msk.f32.mxu1 %vm377_vm5, %v3104_v36 }
 0x746   :  { %v999_v45 = vrot.slane %v986_v39, %v3022_v30 }
 0x748   :  { %v1007_v46 = vadd.f32 %v1005_v41, %v999_v45  ;;  %v1008_v47 = vadd.f32 %v1006_v42, %v999_v45  ;;  %v1001_v48 = vadd.f32 %v999_v45, %v993_v43  ;;  %v1002_v50 = vadd.f32 %v999_v45, %v994_v44 }
 0x74a   :  { %v1009_v51 = vmax.f32 %v1007_v46, 0.0  ;;  %v1010_v34 = vmax.f32 %v1008_v47, 0.0  ;;  %v1003_v37 = vmax.f32 %v1001_v48, 0.0  ;;  %v1004_v49 = vmax.f32 %v1002_v50, 0.0 }
 0x74c   :  { %v1394_v53 = vpack.c.bf16 %v1010_v34, %v1009_v51  ;;  %v1022_v55 = vpack.c.bf16 %v1004_v49, %v1003_v37 }
 0x74e   :  { %2440 = vmatmul.mubr.msk.bf16.vlgmr.msra.gmra.mrb[12].mxu0 %vm344_vm2, %v1022_v55 }
 0x821   :  { %v1063_v40 = vpop.f32.mrb[12].mxu0 }
 0x822   :  { %v2441_v52 = vpop.f32.mrb[13].mxu0 }
 0x823   :  { %v1066_v54 = vpop.f32.mrb[14].mxu0 }
 0x824   :  { %v2610_v56 = vpack.i.bf16 %v1066_v54, %v1063_v40  ;;  %v2529_v57 = vpack.c.bf16 %v1066_v54, %v1063_v40  ;;  %v2442_v58 = vpop.f32.mrb[15].mxu0 }
 0x826   :  { %2611 = vrot.lane.b32.xlu1 %v2610_v56, %s2768_s26  ;;  %2530 = vmatprep.subr.bf16.mxu1 %v2529_v57 }
 0x827   :  { %2532 = vmatpush3.bf16.msra.mxu1 %v2529_v57 }
 0x84f   :  { %1182 = vxpose.xlu1.b32.start.end [1/1] (short) (narrow) %v1181_v59, 32  ;;  %v2299_v59 = vld [vmem:[%s3468_s11 + $0x4] sm:$0xf] }
 0x898   :  { %v2612_v60 = vpop.permute.xlu1 %2611 }
 0x899   :  { %v2614_v61 = vunpack.i.h.bf16 %v2612_v60  ;;  %v2613_v62 = vunpack.i.l.bf16 %v2612_v60 }
 0x89b   :  { %v2533_v63 = vpack.c.bf16 %v2614_v61, %v2613_v62 }
 0x89d   :  { %2534 = vmatprep.subr.bf16.mxu1 %v2533_v63 }
 0x89e   :  { %2536 = vmatpush3.bf16.msra.mxu1 %v2533_v63 }
 0x89f   :  { %2465 = vmatprep.subr.bf16.mxu1 %v2762_v2 }
 0x8a1   :  { %2452 = vmatmul.mubr.msk.f32.vlgmr.msra.gmra.mrb[16].mxu1 %vm377_vm5, %v3115_v0 }
 0x8a2   :  { %2454 = vmatprep.mubr.msk.f32.mxu1 %vm377_vm5, %v3120_v1  ;;  %2466 = vmatpush3.bf16.msra.mxu1 %v3069_v35  ;;  %v2727_v35 = vld [vmem:[%s3472_s15] sm:$0xff]  }
 0x8a3   :  { %2457 = vmatprep.subr.bf16.mxu0 %v2727_v35  ;;  %2485 = vmatprep.subr.bf16.mxu1 %v2727_v35 }
 0x8a4   :  { %2458 = vmatpush3.bf16.msra.mxu0 %v2727_v35 }
 0x8a5   :  { %2455 = vmatmul.mubr.msk.f32.gmra.mrb[18].mxu1 %vm377_vm5, %v3130_v3  ;;  %2545 = vmatprep.subr.msk.bf16.mxu0 %vm805_vm7, %v2728_v10 }
 0x8a6   :  { %2467 = vmatprep.mubr.msk.bf16.mxu1 %vm2763_vm0, %v2762_v2 }
 0x8a8   :  { %2460 = vmatpush3.bf16.msra.mxu0 %v1311_v11 }
 0x8a9   :  { %2468 = vmatmul.mubr.msk.bf16.vlgmr.msra.gmra.mrb[20].mxu1 %vm344_vm2, %v1394_v53 }
 0x8aa   :  { %2486 = vmatpush3.bf16.msra.mxu1 %v2727_v35 }
 0x8ab   :  { %2546 = vmatprep.subr.msk.bf16.mxu1 %vm805_vm7, %v2728_v10 }
 0x8ae   :  { %2488 = vmatpush3.bf16.msra.mxu1 %v1311_v11 }
 0x8cf   :  { %v1198_v4 = vpop.trf.xlu1 }
 0x8d3   :  { %v1199_v5 = vpop.trf.xlu1 }
 0x8d4   :  { %v2615_v6 = vpack.i.bf16 %v1199_v5, %v1198_v4 }
 0x8d6   :  { %2616 = vrot.lane.b32.xlu0 %v2615_v6, %s2769_s4 }
 0x8d7   :  { %v1200_v7 = vpop.trf.xlu1 }
 0x8db   :  { %v1201_v8 = vpop.trf.xlu1 }
 0x8dc   :  { %v2620_v9 = vpack.i.bf16 %v1201_v8, %v1200_v7 }
 0x8de   :  { %2621 = vrot.lane.b32.xlu0 %v2620_v9, %s2769_s4 }
 0x948   :  { %v2617_v12 = vpop.permute.xlu0 %2616 }
 0x949   :  { %v2619_v15 = vunpack.i.h.bf16 %v2617_v12  ;;  %v2618_v19 = vunpack.i.l.bf16 %v2617_v12 }
 0x950   :  { %v2622_v18 = vpop.permute.xlu0 %2621 }
 0x951   :  { %v2624_v26 = vunpack.i.h.bf16 %v2622_v18  ;;  %v2623_v33 = vunpack.i.l.bf16 %v2622_v18 }
 0x974   :  { %v2453_v14 = vpop.f32.mrb[16].mxu1 }
 0x975   :  { %v1168_v16 = vadd.f32 %v2453_v14, %v3152_v13  ;;  %v1162_v17 = vpop.f32.mrb[17].mxu1 }
 0x976   :  { %v1163_v20 = vadd.f32 %v3152_v13, %v1162_v17 }
 0x977   :  { %v1232_v21 = vsel %vm1230_vm9, %v1168_v16, %v2619_v15 }
 0x978   :  { %v1240_v22 = vrot.slane %v1232_v21, 7  ;;  %v1252_v23 = vrot.slane %v1232_v21, 1  ;;  %v1231_v24 = vsel %vm1230_vm9, %v1163_v20, %v2618_v19  ;;  %v2456_v25 = vpop.f32.mrb[18].mxu1 }
 0x979   :  { %v1239_v27 = vrot.slane %v1231_v24, 7  ;;  %v1251_v28 = vrot.slane %v1231_v24, 1  ;;  %v1178_v29 = vadd.f32 %v2456_v25, %v3152_v13  ;;  %v1172_v31 = vpop.f32.mrb[19].mxu1  ;;  %v2625_v32 = vpack.i.bf16 %v1232_v21, %v1231_v24 }
 0x97a   :  { %v1173_v38 = vadd.f32 %v3152_v13, %v1172_v31 }
 0x97b   :  { %2626 = vrot.lane.b32.xlu0 %v2625_v32, %s2765_s27  ;;  %v1234_v39 = vsel %vm1230_vm9, %v1178_v29, %v2624_v26  ;;  %v1253_v41 = vsel %vm356_vm3, %v1251_v28, %v1252_v23  ;;  %v1241_v42 = vsel %vm349_vm4, %v1239_v27, %v1240_v22  ;;  %v1250_v5 = vsel %vm349_vm4, 0.0, %v1239_v27 }
 0x97c   :  { %v1233_v43 = vsel %vm1230_vm9, %v1173_v38, %v2623_v33  ;;  %v1432_v44 = vpop.f32.mrb[20].mxu1  ;;  %v1244_v45 = vrot.slane %v1234_v39, 7  ;;  %v1256_v46 = vrot.slane %v1234_v39, 1 }
 0x97d   :  { %v1242_v47 = vrot.slane %v1233_v43, 7  ;;  %v1254_v48 = vrot.slane %v1233_v43, 1  ;;  %v2469_v50 = vpop.f32.mrb[21].mxu1  ;;  %v2630_v51 = vpack.i.bf16 %v1234_v39, %v1233_v43 }
 0x97e   :  { %v1435_v34 = vpop.f32.mrb[22].mxu1  ;;  %v1259_v37 = vsel %vm356_vm3, %v1256_v46, 0.0 }
 0x97f   :  { %v2645_v49 = vpack.i.bf16 %v1435_v34, %v1432_v44  ;;  %v2537_v53 = vpack.c.bf16 %v1435_v34, %v1432_v44  ;;  %v2470_v55 = vpop.f32.mrb[23].mxu1  ;;  %2631 = vrot.lane.b32.xlu0 %v2630_v51, %s2765_s27  ;;  %v1255_v40 = vsel %vm356_vm3, %v1252_v23, %v1254_v48  ;;  %v1257_v52 = vsel %vm356_vm3, %v1254_v48, %v1256_v46 }
 0x980   :  { %v2635_v54 = vpack.i.bf16 %v1255_v40, %v1253_v41  ;;  %v2640_v56 = vpack.i.bf16 %v1259_v37, %v1257_v52  ;;  %v1243_v57 = vsel %vm349_vm4, %v1240_v22, %v1242_v47  ;;  %v1245_v58 = vsel %vm349_vm4, %v1242_v47, %v1244_v45 }
 0x981   :  { %2538 = vmatprep.subr.bf16.mxu0 %v2537_v53 }
 0x983   :  { %2636 = vrot.lane.b32.xlu0 %v2635_v54, %s2766_s5 }
 0x987   :  { %2641 = vrot.lane.b32.xlu0 %v2640_v56, %s2766_s5 }
 0x98b   :  { %2646 = vrot.lane.b32.xlu0 %v2645_v49, %s2768_s26 }
 0x9a9   :  { %1534 = vxpose.xlu0.b32.start.end [1/1] (short) (narrow) %v2299_v59, 32 }
 0x9ed   :  { %v2627_v60 = vpop.permute.xlu0 %2626 }
 0x9ee   :  { %v2629_v62 = vunpack.i.h.bf16 %v2627_v60  ;;  %v2628_v63 = vunpack.i.l.bf16 %v2627_v60 }
 0x9f0   :  { %v1285_v8 = vsel %vm344_vm2, %v1250_v5, %v2628_v63  ;;  %v1286_v9 = vsel %vm344_vm2, %v1241_v42, %v2629_v62 }
 0x9f1   :  { %v2632_v61 = vpop.permute.xlu0 %2631 }
 0x9f2   :  { %v2634_v35 = vunpack.i.h.bf16 %v2632_v61  ;;  %v2633_v10 = vunpack.i.l.bf16 %v2632_v61 }
 0x9f4   :  { %v1288_v18 = vsel %vm344_vm2, %v1245_v58, %v2634_v35  ;;  %v1287_v19 = vsel %vm344_vm2, %v1243_v57, %v2633_v10 }
 0x9f5   :  { %v2637_v4 = vpop.permute.xlu0 %2636 }
 0x9f6   :  { %v2639_v6 = vunpack.i.h.bf16 %v2637_v4  ;;  %v2638_v7 = vunpack.i.l.bf16 %v2637_v4 }
 0x9f8   :  { %v1289_v11 = vsel %vm168_vm1, %v1285_v8, %v2638_v7  ;;  %v1290_v12 = vsel %vm168_vm1, %v1286_v9, %v2639_v6 }
 0x9f9   :  { %v1293_v14 = vpack.c.bf16 %v1290_v12, %v1289_v11  ;;  %v2642_v15 = vpop.permute.xlu0 %2641 }
 0x9fa   :  { %v2644_v16 = vunpack.i.h.bf16 %v2642_v15  ;;  %v2643_v17 = vunpack.i.l.bf16 %v2642_v15 }
 0x9fb   :  { %2461 = vmatprep.mubr.msk.bf16.mxu0 %vm801_vm8, %v1293_v14 }
 0x9fc   :  { %v1292_v20 = vsel %vm168_vm1, %v1288_v18, %v2644_v16  ;;  %v1291_v21 = vsel %vm168_vm1, %v1287_v19, %v2643_v17 }
 0x9fd   :  { %v1294_v22 = vpack.c.bf16 %v1292_v20, %v1291_v21  ;;  %v2647_v23 = vpop.permute.xlu0 %2646 }
 0x9fe   :  { %v2649_v24 = vunpack.i.h.bf16 %v2647_v23  ;;  %v2648_v25 = vunpack.i.l.bf16 %v2647_v23 }
 0x9ff   :  { %2462 = vmatmul.mubr.msk.bf16.vlgmr.msra.gmra.mrb[16].mxu0 %vm801_vm8, %v1294_v22 }
 0xa00   :  { %v2541_v26 = vpack.c.bf16 %v2649_v24, %v2648_v25  ;;  %2540 = vmatpush3.bf16.msra.mxu0 %v2537_v53  ;;  %2479 = vmatprep.mubr.msk.f32.mxu0 %vm377_vm5, %v3104_v36 }
 0xa02   :  { %2542 = vmatprep.subr.bf16.mxu0 %v2541_v26 }
 0xa04   :  { %2544 = vmatpush3.bf16.msra.mxu0 %v2541_v26 }
 0xa07   :  { %2480 = vmatmul.mubr.msk.f32.vlgmr.msra.gmra.mrb[20].mxu0 %vm377_vm5, %v3115_v0 }
 0xa08   :  { %2482 = vmatprep.mubr.msk.f32.mxu0 %vm377_vm5, %v3120_v1 }
 0xa0b   :  { %2483 = vmatmul.mubr.msk.f32.gmra.mrb[22].mxu0 %vm377_vm5, %v3130_v3 }
 0xa29   :  { %v1550_v27 = vpop.trf.xlu0 }
 0xa2d   :  { %v1551_v28 = vpop.trf.xlu0 }
 0xa2e   :  { %v2650_v29 = vpack.i.bf16 %v1551_v28, %v1550_v27 }
 0xa30   :  { %2651 = vrot.lane.b32.xlu1 %v2650_v29, %s2769_s4 }
 0xa31   :  { %v1552_v31 = vpop.trf.xlu0 }
 0xa35   :  { %v1553_v32 = vpop.trf.xlu0 }
 0xa36   :  { %v2655_v33 = vpack.i.bf16 %v1553_v32, %v1552_v31 }
 0xa38   :  { %2656 = vrot.lane.b32.xlu0 %v2655_v33, %s2769_s4 }
 0xaa2   :  { %v2652_v50 = vpop.permute.xlu1 %2651 }
 0xaa3   :  { %v2654_v52 = vunpack.i.h.bf16 %v2652_v50  ;;  %v2653_v58 = vunpack.i.l.bf16 %v2652_v50 }
 0xaaa   :  { %v2657_v60 = vpop.permute.xlu0 %2656 }
 0xaab   :  { %v2659_v9 = vunpack.i.h.bf16 %v2657_v60  ;;  %v2658_v11 = vunpack.i.l.bf16 %v2657_v60 }
 0xad2   :  { %v3198_v36 = vpop.f32.mrb[16].mxu0 }
 0xad3   :  { %v3200_v38 = vpop.f32.mrb[17].mxu0  ;;  %v1378_v39 = vmul.f32 %v3198_v36, %v3198_v36  ;;  %v1365_v45 = vsel %vm1230_vm9, %v3198_v36, 0.0 }
 0xad4   :  { %v1376_v0 = vmul.f32 %v3200_v38, %v3200_v38  ;;  %v3204_v1 = vpop.f32.mrb[18].mxu0  ;;  %v1362_v41 = vsel %vm1230_vm9, %v3200_v38, 0.0 }
 0xad5   :  { %v3206_v3 = vpop.f32.mrb[19].mxu0  ;;  %v1379_v47 = vmul.f32 %v3204_v1, %v3204_v1  ;;  %v1383_v37 = vsel %vm1230_vm9, %v1378_v39, 0.0  ;;  %v1367_v49 = vsel %vm1230_vm9, %v3204_v1, 0.0 }
 0xad6   :  { %v1363_v42 = vsel %vm1230_vm9, %v3206_v3, 0.0  ;;  %v1377_v43 = vmul.f32 %v3206_v3, %v3206_v3  ;;  %v1380_v46 = vsel %vm1230_vm9, %v1376_v0, 0.0 }
 0xad7   :  { %v1364_v44 = vadd.f32 %v1363_v42, %v1362_v41  ;;  %v1385_v57 = vsel %vm1230_vm9, %v1379_v47, 0.0 }
 0xad8   :  { %v1381_v48 = vsel %vm1230_vm9, %v1377_v43, 0.0 }
 0xad9   :  { %v1366_v51 = vadd.f32 %v1365_v45, %v1364_v44  ;;  %v1382_v34 = vadd.f32 %v1381_v48, %v1380_v46 }
 0xada   :  { %v2481_v53 = vpop.f32.mrb[20].mxu0 }
 0xadb   :  { %v3225_v55 = vadd.f32 %v1367_v49, %v1366_v51  ;;  %v1384_v40 = vadd.f32 %v1383_v37, %v1382_v34  ;;  %v1519_v54 = vadd.f32 %v2481_v53, %v3152_v13  ;;  %v1513_v56 = vpop.f32.mrb[21].mxu0 }
 0xadc   :  { %v1514_v59 = vadd.f32 %v3152_v13, %v1513_v56 }
 0xadd   :  { %v3230_v61 = vadd.f32 %v1385_v57, %v1384_v40  ;;  %v1583_v62 = vsel %vm1230_vm9, %v1519_v54, %v2654_v52 }
 0xade   :  { %v1591_v63 = vrot.slane %v1583_v62, 7  ;;  %v1603_v4 = vrot.slane %v1583_v62, 1  ;;  %v1582_v5 = vsel %vm1230_vm9, %v1514_v59, %v2653_v58  ;;  %v2484_v6 = vpop.f32.mrb[22].mxu0  ;;  %v1369_v58 = vrot.slane %v3225_v55, 4 }
 0xadf   :  { %v1590_v7 = vrot.slane %v1582_v5, 7  ;;  %v1602_v8 = vrot.slane %v1582_v5, 1  ;;  %v1523_v35 = vpop.f32.mrb[23].mxu0  ;;  %v1529_v10 = vadd.f32 %v2484_v6, %v3152_v13  ;;  %v2660_v14 = vpack.i.bf16 %v1583_v62, %v1582_v5 }
 0xae0   :  { %v1524_v12 = vadd.f32 %v3152_v13, %v1523_v35 }
 0xae1   :  { %v1604_v15 = vsel %vm356_vm3, %v1602_v8, %v1603_v4  ;;  %v1592_v16 = vsel %vm349_vm4, %v1590_v7, %v1591_v63  ;;  %2661 = vrot.lane.b32.xlu1 %v2660_v14, %s2765_s27  ;;  %v1585_v18 = vsel %vm1230_vm9, %v1529_v10, %v2659_v9  ;;  %v1601_v41 = vsel %vm349_vm4, 0.0, %v1590_v7 }
 0xae2   :  { %v1584_v17 = vsel %vm1230_vm9, %v1524_v12, %v2658_v11  ;;  %v1595_v21 = vrot.slane %v1585_v18, 7  ;;  %v1607_v23 = vrot.slane %v1585_v18, 1  ;;  %v1370_v9 = vadd.f32 %v1369_v58, %v3225_v55 }
 0xae3   :  { %v1593_v19 = vrot.slane %v1584_v17, 7  ;;  %v1605_v20 = vrot.slane %v1584_v17, 1  ;;  %v2665_v22 = vpack.i.bf16 %v1585_v18, %v1584_v17 }
 0xae4   :  { %v1610_v27 = vsel %vm356_vm3, %v1607_v23, 0.0 }
 0xae5   :  { %v1606_v24 = vsel %vm356_vm3, %v1603_v4, %v1605_v20  ;;  %v1594_v13 = vsel %vm349_vm4, %v1591_v63, %v1593_v19  ;;  %2666 = vrot.lane.b32.xlu1 %v2665_v22, %s2765_s27  ;;  %v1608_v26 = vsel %vm356_vm3, %v1605_v20, %v1607_v23  ;;  %v1596_v28 = vsel %vm349_vm4, %v1593_v19, %v1595_v21 }
 0xae6   :  { %v2670_v25 = vpack.i.bf16 %v1606_v24, %v1604_v15  ;;  %v2675_v29 = vpack.i.bf16 %v1610_v27, %v1608_v26  ;;  %v1387_v63 = vrot.slane %v3230_v61, 4  ;;  %v1371_v20 = vrot.slane %v1370_v9, 2 }
 0xae8   :  { %v1388_v15 = vadd.f32 %v1387_v63, %v3230_v61 }
 0xae9   :  { %2671 = vrot.lane.b32.xlu1 %v2670_v25, %s2766_s5  ;;  %v1372_v25 = vadd.f32 %v1371_v20, %v1370_v9 }
 0xaea   :  { %v1389_v23 = vrot.slane %v1388_v15, 2 }
 0xaed   :  { %2676 = vrot.lane.b32.xlu1 %v2675_v29, %s2766_s5 }
 0xb53   :  { %v2662_v31 = vpop.permute.xlu1 %2661 }
 0xb54   :  { %v2664_v33 = vunpack.i.h.bf16 %v2662_v31  ;;  %v2663_v0 = vunpack.i.l.bf16 %v2662_v31  ;;  %v1373_v31 = vrot.slane %v1372_v25, 1 }
 0xb56   :  { %v1636_v44 = vsel %vm344_vm2, %v1601_v41, %v2663_v0  ;;  %v1637_v45 = vsel %vm344_vm2, %v1592_v16, %v2664_v33 }
 0xb57   :  { %v2667_v32 = vpop.permute.xlu1 %2666 }
 0xb58   :  { %v2669_v46 = vunpack.i.h.bf16 %v2667_v32  ;;  %v2668_v47 = vunpack.i.l.bf16 %v2667_v32 }
 0xb5a   :  { %v1639_v53 = vsel %vm344_vm2, %v1596_v28, %v2669_v46  ;;  %v1638_v40 = vsel %vm344_vm2, %v1594_v13, %v2668_v47  ;;  %v1390_v28 = vadd.f32 %v1389_v23, %v1388_v15 }
 0xb5b   :  { %v2672_v39 = vpop.permute.xlu1 %2671 }
 0xb5c   :  { %v2674_v42 = vunpack.i.h.bf16 %v2672_v39  ;;  %v2673_v43 = vunpack.i.l.bf16 %v2672_v39  ;;  %v1391_v0 = vrot.slane %v1390_v28, 1 }
 0xb5e   :  { %v1640_v48 = vsel %vm168_vm1, %v1636_v44, %v2673_v43  ;;  %v1641_v50 = vsel %vm168_vm1, %v1637_v45, %v2674_v42  ;;  %v1374_v42 = vadd.f32 %v1373_v31, %v1372_v25  ;;  %v1392_v45 = vadd.f32 %v1391_v0, %v1390_v28 }
 0xb5f   :  { %v1644_v51 = vpack.c.bf16 %v1641_v50, %v1640_v48  ;;  %v2677_v34 = vpop.permute.xlu1 %2676 }
 0xb60   :  { %v2679_v37 = vunpack.i.h.bf16 %v2677_v34  ;;  %v2678_v49 = vunpack.i.l.bf16 %v2677_v34 }
 0xb61   :  { %2489 = vmatprep.mubr.msk.bf16.mxu1 %vm801_vm8, %v1644_v51 }
 0xb62   :  { %v1643_v52 = vsel %vm168_vm1, %v1639_v53, %v2679_v37  ;;  %v1642_v54 = vsel %vm168_vm1, %v1638_v40, %v2678_v49  ;;  %v1733_v40 = vld [vmem:[%s3473_s16] sm:$0x1] }
 0xb63   :  { %v1645_v56 = vpack.c.bf16 %v1643_v52, %v1642_v54 }
 0xb65   :  { %2490 = vmatmul.mubr.msk.bf16.vlgmr.msra.gmra.mrb[24].mxu1 %vm801_vm8, %v1645_v56  ;;  %v1734_v56 = vld [vmem:[%s3474_s17] sm:$0x1] }
 0xc38   :  { %v3260_v57 = vpop.f32.mrb[24].mxu1 }
 0xc39   :  { %v3263_v59 = vpop.f32.mrb[25].mxu1  ;;  %v1717_v5 = vmul.f32 %v3260_v57, %v3260_v57  ;;  %v1704_v10 = vsel %vm1230_vm9, %v3260_v57, 0.0 }
 0xc3a   :  { %v1715_v60 = vmul.f32 %v3263_v59, %v3263_v59  ;;  %v2492_v62 = vpop.f32.mrb[26].mxu1  ;;  %v1701_v6 = vsel %vm1230_vm9, %v3263_v59, 0.0 }
 0xc3b   :  { %v1689_v4 = vpop.f32.mrb[27].mxu1  ;;  %v1718_v12 = vmul.f32 %v2492_v62, %v2492_v62  ;;  %v1722_v18 = vsel %vm1230_vm9, %v1717_v5, 0.0  ;;  %v1706_v19 = vsel %vm1230_vm9, %v2492_v62, 0.0 }
 0xc3c   :  { %v1702_v7 = vsel %vm1230_vm9, %v1689_v4, 0.0  ;;  %v1716_v8 = vmul.f32 %v1689_v4, %v1689_v4  ;;  %v1719_v11 = vsel %vm1230_vm9, %v1715_v60, 0.0 }
 0xc3d   :  { %v1703_v35 = vadd.f32 %v1702_v7, %v1701_v6  ;;  %v1724_v22 = vsel %vm1230_vm9, %v1718_v12, 0.0 }
 0xc3e   :  { %v1720_v14 = vsel %vm1230_vm9, %v1716_v8, 0.0 }
 0xc3f   :  { %v1705_v16 = vadd.f32 %v1704_v10, %v1703_v35  ;;  %v1721_v17 = vadd.f32 %v1720_v14, %v1719_v11 }
 0xc41   :  { %v1707_v21 = vadd.f32 %v1706_v19, %v1705_v16  ;;  %v1723_v55 = vadd.f32 %v1722_v18, %v1721_v17 }
 0xc43   :  { %v1708_v24 = vrot.slane %v1707_v21, 4  ;;  %v1725_v13 = vadd.f32 %v1724_v22, %v1723_v55 }
 0xc45   :  { %v1709_v26 = vadd.f32 %v1708_v24, %v1707_v21  ;;  %v1726_v27 = vrot.slane %v1725_v13, 4 }
 0xc47   :  { %v1710_v29 = vrot.slane %v1709_v26, 2  ;;  %v1727_v61 = vadd.f32 %v1726_v27, %v1725_v13 }
 0xc49   :  { %v1711_v32 = vadd.f32 %v1710_v29, %v1709_v26  ;;  %v1728_v33 = vrot.slane %v1727_v61, 2 }
 0xc4b   :  { %v1712_v39 = vrot.slane %v1711_v32, 1  ;;  %v1729_v41 = vadd.f32 %v1728_v33, %v1727_v61 }
 0xc4d   :  { %v1713_v43 = vadd.f32 %v1712_v39, %v1711_v32  ;;  %v1730_v44 = vrot.slane %v1729_v41, 1 }
 0xc4f   :  { %v1714_v46 = vadd.f32 %v1713_v43, %v1374_v42  ;;  %v1731_v47 = vadd.f32 %v1730_v44, %v1729_v41 }
 0xc51   :  { %v1732_v48 = vadd.f32 %v1731_v47, %v1392_v45  ;;  %v1736_v50 = vmul.f32 0.015625, %v1714_v46 }
 0xc53   :  { %v1737_v51 = vmul.f32 0.015625, %v1732_v48  ;;  %v1738_v34 = vmul.f32 %v1736_v50, %v1736_v50 }
 0xc55   :  { %v1739_v37 = vsub.f32 %v1737_v51, %v1738_v34 }
 0xc57   :  { %v1740_v49 = vmax.f32 %v1739_v37, 0.0 }
 0xc59   :  { %v1741_v53 = vadd.f32 1e-05, %v1740_v49 }
 0xc5b   :  { %2734 = vrsqrt.f32 %v1741_v53 }
 0xc65   :  { %v2735_v52 = vpop.eup %2734 }
 0xc66   :  { %v1743_v54 = vmul.f32 %v2735_v52, %v1733_v40 }
 0xc68   :  { %v1744_v58 = vmul.f32 %v1743_v54, %v1736_v50  ;;  %v1750_v60 = vrot.slane %v1743_v54, %v3022_v30  ;;  %v2729_v50 = vld [vmem:[%s3475_s18] sm:$0x3f]  }
 0xc69   :  { %2547 = vmatprep.subr.msk.bf16.mxu0 %vm1842_vm10, %v2729_v50  ;;  %2548 = vmatprep.subr.msk.bf16.mxu1 %vm1842_vm10, %v2729_v50 }
 0xc6a   :  { %v1745_v63 = vsub.f32 %v1734_v56, %v1744_v58  ;;  %v1928_v5 = vmul.f32 %v1750_v60, %v1689_v4  ;;  %v1929_v6 = vmul.f32 %v3260_v57, %v1750_v60  ;;  %v1930_v7 = vmul.f32 %v2492_v62, %v1750_v60 }
 0xc6b   :  { %v1752_v8 = vmul.f32 %v1750_v60, %v3200_v38  ;;  %v1753_v9 = vmul.f32 %v1750_v60, %v3206_v3  ;;  %v1754_v35 = vmul.f32 %v3198_v36, %v1750_v60  ;;  %v1755_v10 = vmul.f32 %v3204_v1, %v1750_v60 }
 0xc6c   :  { %v1760_v11 = vrot.slane %v1745_v63, %v3022_v30  ;;  %v1927_v12 = vmul.f32 %v1750_v60, %v3263_v59 }
 0xc6e   :  { %v1932_v14 = vadd.f32 %v1928_v5, %v1760_v11  ;;  %v1933_v15 = vadd.f32 %v1929_v6, %v1760_v11  ;;  %v1934_v16 = vadd.f32 %v1930_v7, %v1760_v11  ;;  %v1762_v17 = vadd.f32 %v1760_v11, %v1752_v8 }
 0xc6f   :  { %v1763_v4 = vadd.f32 %v1760_v11, %v1753_v9  ;;  %v1764_v18 = vadd.f32 %v1760_v11, %v1754_v35  ;;  %v1765_v57 = vadd.f32 %v1760_v11, %v1755_v10  ;;  %v1931_v62 = vadd.f32 %v1927_v12, %v1760_v11 }
 0xc70   :  { %v1936_v19 = vmax.f32 %v1932_v14, 0.0  ;;  %v1937_v38 = vmax.f32 %v1933_v15, 0.0  ;;  %v1938_v20 = vmax.f32 %v1934_v16, 0.0  ;;  %v3296_v3 = vmax.f32 %v1762_v17, 0.0 }
 0xc71   :  { %v1767_v36 = vmax.f32 %v1763_v4, 0.0  ;;  %v1768_v21 = vmax.f32 %v1764_v18, 0.0  ;;  %v1769_v1 = vmax.f32 %v1765_v57, 0.0  ;;  %v3298_v55 = vmax.f32 %v1931_v62, 0.0 }
 0xc72   :  { %v1944_v22 = vrot.slane %v1936_v19, 7  ;;  %v2695_v59 = vpack.i.bf16 %v1938_v20, %v1937_v38  ;;  %v1786_v23 = vrot.slane %v3296_v3, 1  ;;  %v1956_v24 = vrot.slane %v1936_v19, 1 }
 0xc73   :  { %v2680_v13 = vpack.i.bf16 %v1767_v36, %v3296_v3  ;;  %v1789_v25 = vrot.slane %v1768_v21, 1  ;;  %v1791_v26 = vrot.slane %v1769_v1, 1  ;;  %v2685_v27 = vpack.i.bf16 %v1936_v19, %v3298_v55 }
 0xc74   :  { %2696 = vrot.lane.b32.xlu0 %v2695_v59, %s2769_s4  ;;  %v2690_v28 = vpack.i.bf16 %v1769_v1, %v1768_v21  ;;  %v1787_v29 = vrot.slane %v1767_v36, 1  ;;  %v1955_v61 = vrot.slane %v3298_v55, 1  ;;  %v1958_v31 = vrot.slane %v1937_v38, 1 }
 0xc75   :  { %2681 = vrot.lane.b32.xlu1 %v2680_v13, %s2769_s4  ;;  %v1792_v32 = vsel %vm356_vm3, %v1789_v25, %v1791_v26  ;;  %v1794_v33 = vsel %vm356_vm3, %v1791_v26, 0.0  ;;  %v1960_v0 = vrot.slane %v1938_v20, 1  ;;  %v1948_v39 = vrot.slane %v1938_v20, 7 }
 0xc76   :  { %v2710_v41 = vpack.i.bf16 %v1794_v33, %v1792_v32  ;;  %v1788_v42 = vsel %vm356_vm3, %v1786_v23, %v1787_v29  ;;  %v1790_v43 = vsel %vm356_vm3, %v1787_v29, %v1789_v25  ;;  %v1957_v44 = vsel %vm356_vm3, %v1955_v61, %v1956_v24 }
 0xc77   :  { %v2700_v45 = vpack.i.bf16 %v1790_v43, %v1788_v42  ;;  %v1959_v46 = vsel %vm356_vm3, %v1956_v24, %v1958_v31  ;;  %v1961_v47 = vsel %vm356_vm3, %v1958_v31, %v1960_v0  ;;  %v1963_v48 = vsel %vm356_vm3, %v1960_v0, 0.0 }
 0xc78   :  { %2711 = vrot.lane.b32.xlu0 %v2710_v41, %s2765_s27  ;;  %v2705_v51 = vpack.i.bf16 %v1959_v46, %v1957_v44  ;;  %v2715_v34 = vpack.i.bf16 %v1963_v48, %v1961_v47  ;;  %v1946_v37 = vrot.slane %v1937_v38, 7  ;;  %v1775_v49 = vrot.slane %v1767_v36, 7 }
 0xc79   :  { %2686 = vrot.lane.b32.xlu1 %v2685_v27, %s2769_s4  ;;  %v1774_v53 = vrot.slane %v3296_v3, 7  ;;  %v1943_v40 = vrot.slane %v3298_v55, 7  ;;  %v1777_v52 = vrot.slane %v1768_v21, 7  ;;  %v1779_v54 = vrot.slane %v1769_v1, 7 }
 0xc7a   :  { %v3322_v56 = vsel %vm349_vm4, %v1944_v22, %v1946_v37  ;;  %v3325_v58 = vsel %vm349_vm4, %v1946_v37, %v1948_v39  ;;  %v1844_v7 = vsel %vm1842_vm10, %v2729_v50, 0  ;;  %v2135_v50 = vld [vmem:[#allocation2] sm:$0x1] }
 0xc7b   :  { %v1776_v60 = vsel %vm349_vm4, %v1774_v53, %v1775_v49  ;;  %v1945_v63 = vsel %vm349_vm4, %v1943_v40, %v1944_v22  ;;  %v1778_v5 = vsel %vm349_vm4, %v1775_v49, %v1777_v52  ;;  %v1780_v6 = vsel %vm349_vm4, %v1777_v52, %v1779_v54  ;;  %2494 = vmatpush3.bf16.msra.mxu0 %v1844_v7 }
 0xc7c   :  { %2500 = vmatpush3.bf16.msra.mxu1 %v1844_v7  ;;  %2505 = vmatprep.subr.bf16.mxu0 %v2762_v2  ;;  %v1785_v20 = vsel %vm349_vm4, 0.0, %v1774_v53  ;;  %v1954_v26 = vsel %vm349_vm4, 0.0, %v1943_v40 }
 0xc7d   :  { %2691 = vrot.lane.b32.xlu1 %v2690_v28, %s2769_s4  ;;  %2513 = vmatprep.subr.bf16.mxu1 %v2762_v2 }
 0xc81   :  { %2701 = vrot.lane.b32.xlu1 %v2700_v45, %s2765_s27 }
 0xc85   :  { %2706 = vrot.lane.b32.xlu1 %v2705_v51, %s2765_s27  ;;  %v2770_v51 = vmov 0  }
 0xc86   :  { %2720 = vset.pattern.permute.xlu0 %v2770_v51 }
 0xc87   :  { %2140 = vperm.xlu0 %2720, %v2135_v50  }
 0xc89   :  { %2716 = vrot.lane.b32.xlu1 %v2715_v34, %s2765_s27 }
 0xce6   :  { %v2697_v9 = vpop.permute.xlu0 %2696 }
 0xce7   :  { %v2682_v8 = vpop.permute.xlu1 %2681  ;;  %v2699_v29 = vunpack.i.h.bf16 %v2697_v9  ;;  %v2698_v61 = vunpack.i.l.bf16 %v2697_v9 }
 0xce8   :  { %v2684_v15 = vunpack.i.h.bf16 %v2682_v8  ;;  %v2683_v16 = vunpack.i.l.bf16 %v2682_v8 }
 0xce9   :  { %v1991_v44 = vsel %vm1230_vm9, %v3322_v56, %v2698_v61  ;;  %v1992_v45 = vsel %vm1230_vm9, %v3325_v58, %v2699_v29 }
 0xcea   :  { %v2712_v10 = vpop.permute.xlu0 %2711  ;;  %v1820_v1 = vsel %vm1230_vm9, %v1785_v20, %v2683_v16  ;;  %v1821_v55 = vsel %vm1230_vm9, %v1776_v60, %v2684_v15 }
 0xceb   :  { %v2687_v35 = vpop.permute.xlu1 %2686  ;;  %v2714_v17 = vunpack.i.h.bf16 %v2712_v10  ;;  %v2713_v4 = vunpack.i.l.bf16 %v2712_v10 }
 0xcec   :  { %v2689_v22 = vunpack.i.h.bf16 %v2687_v35  ;;  %v2688_v59 = vunpack.i.l.bf16 %v2687_v35 }
 0xcee   :  { %v1990_v31 = vsel %vm1230_vm9, %v1945_v63, %v2689_v22  ;;  %v1989_v32 = vsel %vm1230_vm9, %v1954_v26, %v2688_v59 }
 0xcef   :  { %v2692_v11 = vpop.permute.xlu1 %2691 }
 0xcf0   :  { %v2694_v12 = vunpack.i.h.bf16 %v2692_v11  ;;  %v2693_v14 = vunpack.i.l.bf16 %v2692_v11 }
 0xcf2   :  { %v1823_v18 = vsel %vm1230_vm9, %v1780_v6, %v2694_v12  ;;  %v1822_v57 = vsel %vm1230_vm9, %v1778_v5, %v2693_v14 }
 0xcf3   :  { %v1827_v62 = vsel %vm344_vm2, %v1823_v18, %v2714_v17  ;;  %v1826_v19 = vsel %vm344_vm2, %v1822_v57, %v2713_v4  ;;  %v2702_v38 = vpop.permute.xlu1 %2701 }
 0xcf4   :  { %v1829_v3 = vpack.c.bf16 %v1827_v62, %v1826_v19  ;;  %v2704_v36 = vunpack.i.h.bf16 %v2702_v38  ;;  %v2703_v21 = vunpack.i.l.bf16 %v2702_v38 }
 0xcf6   :  { %v1824_v23 = vsel %vm344_vm2, %v1820_v1, %v2703_v21  ;;  %v1825_v24 = vsel %vm344_vm2, %v1821_v55, %v2704_v36 }
 0xcf7   :  { %v1828_v13 = vpack.c.bf16 %v1825_v24, %v1824_v23  ;;  %v2707_v25 = vpop.permute.xlu1 %2706 }
 0xcf8   :  { %v2709_v27 = vunpack.i.h.bf16 %v2707_v25  ;;  %v2708_v28 = vunpack.i.l.bf16 %v2707_v25 }
 0xcf9   :  { %2495 = vmatprep.mubr.msk.bf16.mxu0 %vm1835_vm11, %v1828_v13 }
 0xcfa   :  { %v1994_v33 = vsel %vm344_vm2, %v1990_v31, %v2709_v27  ;;  %v1993_v0 = vsel %vm344_vm2, %v1989_v32, %v2708_v28  ;;  %2496 = vmatmul.mubr.msk.bf16.vlgmr.msra.gmra.mrb[24].mxu0 %vm1835_vm11, %v1829_v3 }
 0xcfb   :  { %v1997_v39 = vpack.c.bf16 %v1994_v33, %v1993_v0  ;;  %v2717_v41 = vpop.permute.xlu1 %2716  ;;  %2509 = vmatprep.mubr.msk.bf16.mxu0 %vm2763_vm0, %v2762_v2 }
 0xcfc   :  { %v2719_v42 = vunpack.i.h.bf16 %v2717_v41  ;;  %v2718_v43 = vunpack.i.l.bf16 %v2717_v41 }
 0xcfd   :  { %2501 = vmatprep.mubr.msk.bf16.mxu1 %vm1835_vm11, %v1997_v39 }
 0xcfe   :  { %v1996_v46 = vsel %vm344_vm2, %v1992_v45, %v2719_v42  ;;  %v1995_v47 = vsel %vm344_vm2, %v1991_v44, %v2718_v43 }
 0xcff   :  { %v1998_v48 = vpack.c.bf16 %v1996_v46, %v1995_v47 }
 0xd01   :  { %2502 = vmatmul.mubr.msk.bf16.vlgmr.msra.gmra.mrb[28].mxu1 %vm1835_vm11, %v1998_v48 }
 0xd02   :  { %2517 = vmatprep.mubr.msk.bf16.mxu1 %vm2763_vm0, %v2762_v2 }
 0xdcd   :  { %v3365_v34 = vpop.f32.mrb[24].mxu0 }
 0xdce   :  { %v3367_v37 = vpop.f32.mrb[25].mxu0  ;;  %v1911_v52 = vmul.f32 %v3365_v34, %v3365_v34  ;;  %v1898_v63 = vsel %vm1230_vm9, %v3365_v34, 0.0 }
 0xdcf   :  { %v1909_v49 = vmul.f32 %v3367_v37, %v3367_v37  ;;  %v3371_v53 = vpop.f32.mrb[26].mxu0  ;;  %v1895_v54 = vsel %vm1230_vm9, %v3367_v37, 0.0 }
 0xdd0   :  { %v3373_v40 = vpop.f32.mrb[27].mxu0  ;;  %v1912_v6 = vmul.f32 %v3371_v53, %v3371_v53  ;;  %v1916_v10 = vsel %vm1230_vm9, %v1911_v52, 0.0  ;;  %v1900_v11 = vsel %vm1230_vm9, %v3371_v53, 0.0 }
 0xdd1   :  { %v1896_v56 = vsel %vm1230_vm9, %v3373_v40, 0.0  ;;  %v1910_v58 = vmul.f32 %v3373_v40, %v3373_v40  ;;  %v1913_v5 = vsel %vm1230_vm9, %v1909_v49, 0.0 }
 0xdd2   :  { %v1897_v60 = vadd.f32 %v1896_v56, %v1895_v54  ;;  %v1918_v17 = vsel %vm1230_vm9, %v1912_v6, 0.0 }
 0xdd3   :  { %v1914_v7 = vsel %vm1230_vm9, %v1910_v58, 0.0 }
 0xdd4   :  { %v1899_v8 = vadd.f32 %v1898_v63, %v1897_v60  ;;  %v1915_v9 = vadd.f32 %v1914_v7, %v1913_v5  ;;  %v3389_v35 = vpop.f32.mrb[28].mxu1 }
 0xdd5   :  { %v3394_v12 = vpop.f32.mrb[29].mxu1  ;;  %v2070_v20 = vmul.f32 %v3389_v35, %v3389_v35  ;;  %v2057_v55 = vsel %vm1230_vm9, %v3389_v35, 0.0 }
 0xdd6   :  { %v1901_v14 = vadd.f32 %v1900_v11, %v1899_v8  ;;  %v1917_v15 = vadd.f32 %v1916_v10, %v1915_v9  ;;  %v3396_v16 = vpop.f32.mrb[30].mxu1  ;;  %v2068_v4 = vmul.f32 %v3394_v12, %v3394_v12  ;;  %v2054_v19 = vsel %vm1230_vm9, %v3394_v12, 0.0 }
 0xdd7   :  { %v2042_v18 = vpop.f32.mrb[31].mxu1  ;;  %v2071_v59 = vmul.f32 %v3396_v16, %v3396_v16  ;;  %v2059_v25 = vsel %vm1230_vm9, %v3396_v16, 0.0  ;;  %v2075_v28 = vsel %vm1230_vm9, %v2070_v20, 0.0 }
 0xdd8   :  { %v1902_v57 = vrot.slane %v1901_v14, 4  ;;  %v1919_v62 = vadd.f32 %v1918_v17, %v1917_v15  ;;  %v2055_v38 = vsel %vm1230_vm9, %v2042_v18, 0.0  ;;  %v2069_v36 = vmul.f32 %v2042_v18, %v2042_v18 }
 0xdd9   :  { %v2056_v3 = vadd.f32 %v2055_v38, %v2054_v19  ;;  %v2072_v22 = vsel %vm1230_vm9, %v2068_v4, 0.0  ;;  %v2077_v31 = vsel %vm1230_vm9, %v2071_v59, 0.0  ;;  %v2087_v4 = vld [vmem:[%s3477_s20] sm:$0x1] }
 0xdda   :  { %v1903_v21 = vadd.f32 %v1902_v57, %v1901_v14  ;;  %v1920_v1 = vrot.slane %v1919_v62, 4  ;;  %v2073_v24 = vsel %vm1230_vm9, %v2069_v36, 0.0  ;;  %v2086_v14 = vld [vmem:[%s3476_s19] sm:$0x1] }
 0xddb   :  { %v2058_v23 = vadd.f32 %v2057_v55, %v2056_v3  ;;  %v2074_v26 = vadd.f32 %v2073_v24, %v2072_v22 }
 0xddc   :  { %v1921_v13 = vadd.f32 %v1920_v1, %v1919_v62  ;;  %v1904_v27 = vrot.slane %v1903_v21, 2 }
 0xddd   :  { %v2060_v29 = vadd.f32 %v2059_v25, %v2058_v23  ;;  %v2076_v61 = vadd.f32 %v2075_v28, %v2074_v26 }
 0xdde   :  { %v1922_v33 = vrot.slane %v1921_v13, 2  ;;  %v1905_v39 = vadd.f32 %v1904_v27, %v1903_v21 }
 0xddf   :  { %v2061_v32 = vrot.slane %v2060_v29, 4  ;;  %v2078_v0 = vadd.f32 %v2077_v31, %v2076_v61 }
 0xde0   :  { %v1923_v44 = vadd.f32 %v1922_v33, %v1921_v13  ;;  %v1906_v46 = vrot.slane %v1905_v39, 1 }
 0xde1   :  { %v2062_v41 = vadd.f32 %v2061_v32, %v2060_v29  ;;  %v2079_v42 = vrot.slane %v2078_v0, 4 }
 0xde2   :  { %v1924_v51 = vrot.slane %v1923_v44, 1  ;;  %v1907_v52 = vadd.f32 %v1906_v46, %v1905_v39 }
 0xde3   :  { %v2063_v43 = vrot.slane %v2062_v41, 2  ;;  %v2080_v45 = vadd.f32 %v2079_v42, %v2078_v0 }
 0xde4   :  { %v1925_v60 = vadd.f32 %v1924_v51, %v1923_v44  ;;  %v2141_v44 = vpop.permute.xlu0 %2140 }
 0xde5   :  { %v2064_v47 = vadd.f32 %v2063_v43, %v2062_v41  ;;  %v2081_v48 = vrot.slane %v2080_v45, 2  ;;  %v2134_v43 = vld [vmem:[%s3478_s21] sm:$0x1]  ;;  %s2738_s21 = scalar_lea.vmem %s2254_s22, 32 }
 0xde6   :  { %p2739_p0 = scmp.ne.s32.totalorder %s2254_s22, %s2738_s21  ;;  %p2744_p2 = scmp.lt.s32.totalorder %s2738_s21, %s2738_s21 }
 0xde7   :  { %v2065_v50 = vrot.slane %v2064_v47, 1  ;;  %v2082_v49 = vadd.f32 %v2081_v48, %v2080_v45  ;;  %v2146_v45 = vrot.slane %v2141_v44, %v3022_v30 }
 0xde8   :  { %p2745_p3 = por %p2744_p2, %p2743_p1 }
 0xde9   :  { %v2066_v54 = vadd.f32 %v2065_v50, %v2064_v47  ;;  %v2083_v56 = vrot.slane %v2082_v49, 1 }
 0xdea   :  { %p2746_p4 = pnand %p2745_p3, %p2739_p0 }
 0xdeb   :  { %v2067_v58 = vadd.f32 %v2066_v54, %v1907_v52  ;;  %v2084_v63 = vadd.f32 %v2083_v56, %v2082_v49 }
 0xded   :  { %v2088_v5 = vmul.f32 0.015625, %v2067_v58  ;;  %v2085_v6 = vadd.f32 %v2084_v63, %v1925_v60 }
 0xdef   :  { %v2090_v7 = vmul.f32 %v2088_v5, %v2088_v5  ;;  %v2089_v8 = vmul.f32 0.015625, %v2085_v6 }
 0xdf1   :  { %v2091_v9 = vsub.f32 %v2089_v8, %v2090_v7 }
 0xdf3   :  { %v2092_v10 = vmax.f32 %v2091_v9, 0.0 }
 0xdf5   :  { %v2093_v11 = vadd.f32 1e-05, %v2092_v10 }
 0xdf7   :  { %2736 = vrsqrt.f32 %v2093_v11 }
 0xe01   :  { %v2737_v15 = vpop.eup %2736 }
 0xe02   :  { %v2095_v17 = vmul.f32 %v2737_v15, %v2086_v14 }
 0xe04   :  { %v2096_v57 = vmul.f32 %v2095_v17, %v2088_v5  ;;  %v2102_v62 = vrot.slane %v2095_v17, %v3022_v30 }
 0xe06   :  { %v2097_v19 = vsub.f32 %v2087_v4, %v2096_v57  ;;  %v2123_v38 = vmul.f32 %v2102_v62, %v2042_v18  ;;  %v2104_v20 = vmul.f32 %v2102_v62, %v3367_v37  ;;  %v2105_v3 = vmul.f32 %v2102_v62, %v3373_v40 }
 0xe07   :  { %v2122_v36 = vmul.f32 %v2102_v62, %v3394_v12  ;;  %v2106_v21 = vmul.f32 %v3365_v34, %v2102_v62  ;;  %v2107_v1 = vmul.f32 %v3371_v53, %v2102_v62  ;;  %v2124_v55 = vmul.f32 %v3389_v35, %v2102_v62 }
 0xe08   :  { %v2112_v22 = vrot.slane %v2097_v19, %v3022_v30  ;;  %v2125_v59 = vmul.f32 %v3396_v16, %v2102_v62 }
 0xe0a   :  { %v2127_v23 = vadd.f32 %v2123_v38, %v2112_v22  ;;  %v2114_v24 = vadd.f32 %v2112_v22, %v2104_v20  ;;  %v2115_v13 = vadd.f32 %v2112_v22, %v2105_v3  ;;  %v2126_v18 = vadd.f32 %v2122_v36, %v2112_v22 }
 0xe0b   :  { %v2116_v25 = vadd.f32 %v2112_v22, %v2106_v21  ;;  %v2117_v37 = vadd.f32 %v2112_v22, %v2107_v1  ;;  %v2128_v26 = vadd.f32 %v2124_v55, %v2112_v22  ;;  %v2129_v40 = vadd.f32 %v2125_v59, %v2112_v22 }
 0xe0c   :  { %v2131_v27 = vmax.f32 %v2127_v23, 0.0  ;;  %v2118_v12 = vmax.f32 %v2114_v24, 0.0  ;;  %v2119_v28 = vmax.f32 %v2115_v13, 0.0  ;;  %v2130_v34 = vmax.f32 %v2126_v18, 0.0 }
 0xe0d   :  { %v2120_v29 = vmax.f32 %v2116_v25, 0.0  ;;  %v2121_v53 = vmax.f32 %v2117_v37, 0.0  ;;  %v2132_v61 = vmax.f32 %v2128_v26, 0.0  ;;  %v2133_v35 = vmax.f32 %v2129_v40, 0.0 }
 0xe0e   :  { %v2136_v31 = vpack.c.bf16 %v2119_v28, %v2118_v12  ;;  %v2198_v32 = vpack.c.bf16 %v2131_v27, %v2130_v34 }
 0xe0f   :  { %v2137_v33 = vpack.c.bf16 %v2121_v53, %v2120_v29  ;;  %v2199_v16 = vpack.c.bf16 %v2133_v35, %v2132_v61 }
 0xe10   :  { %v2151_v0 = vsel %vm1230_vm9, %v2136_v31, 0  ;;  %v2201_v39 = vsel %vm1230_vm9, %v2198_v32, 0 }
 0xe11   :  { %2506 = vmatpush3.bf16.xpose.msra.mxu0 %v2151_v0  ;;  %2514 = vmatpush3.bf16.xpose.msra.mxu1 %v2201_v39  ;;  %v2154_v41 = vsel %vm1230_vm9, %v2137_v33, 0  ;;  %v2204_v42 = vsel %vm1230_vm9, %v2199_v16, 0 }
 0xe12   :  { %2507 = vmatprep.subr.bf16.mxu0 %v2762_v2  ;;  %2515 = vmatprep.subr.bf16.mxu1 %v2762_v2 }
 0xe19   :  { %2508 = vmatpush3.bf16.xpose.msra.mxu0 %v2154_v41  ;;  %2516 = vmatpush3.bf16.xpose.msra.mxu1 %v2204_v42 }
 0xe20   :  { %2510 = vmatmul.mubr.msk.bf16.vlgmr.msra.gmra.mrb[28].mxu0 %vm1230_vm9, %v2134_v43  ;;  %2518 = vmatmul.mubr.msk.bf16.vlgmr.msra.gmra.mrb[32].mxu1 %vm1230_vm9, %v2134_v43 }
 0xef3   :  { %v2190_v2 = vpop.f32.mrb[28].mxu0  ;;  %v2240_v46 = vpop.f32.mrb[32].mxu1 }
 0xef4   :  { %v2191_v47 = vadd.f32 %v2190_v2, %v2146_v45  ;;  %v2241_v48 = vadd.f32 %v2240_v46, %v2146_v45  ;;  %v2511_v50 = vpop.f32.mrb[29].mxu0  ;;  %v2519_v51 = vpop.f32.mrb[33].mxu1 }
 0xef5   :  { %v2193_v49 = vpop.f32.mrb[30].mxu0  ;;  %v2243_v52 = vpop.f32.mrb[34].mxu1 }
 0xef6   :  { %2197 = vst.msk [vmem:[#allocation3] sm:$0x1] %vm2196_vm12, %v2191_v47  ;;  %2247 = vst.msk [vmem:[#allocation3 + $0x1] sm:$0x1] %vm2196_vm12, %v2241_v48  ;;  %v2512_v54 = vpop.f32.mrb[31].mxu0  ;;  %v2520_v56 = vpop.f32.mrb[35].mxu1 }
 0xef7   :  { %2749 = shalt.err (!%p2746_p4)
}
 0xef8   :  { %s2750_s29 = scalar_lea.hbm %s3480_s23, 32 }
 0xef9   :  { %p2751_p5 = scmp.ne.s32.totalorder %s3480_s23, %s2750_s29  ;;  %p2754_p6 = scmp.lt.u32.totalorder %s2750_s29, %s3480_s23 }
 0xefb   :  { %p2756_p7 = pnand %p2754_p6, %p2751_p5 }
 0xefd   :  { %2759 = shalt.err (!%p2756_p7)
}
 0xefe   :  { %s2772_s8 = smov 1  }
 0xeff   :  { %2259 = dma.vmem_to_hbm [thread:$0]  %s2254_s22, 32, %s3480_s23, [#allocation4], %s2766_s5, %s2766_s5, %s2772_s8  }
 0xf00   :  { %2760 = dma.done.wait [#allocation4], 32  }
 0xf01   :  { %2761 = vsyncadd [#allocation4], 4294967264 }
 0xf02   :  { %2263 = vsyncpa [#allocation4], 1 }

</bundles_post_ra>
